<compile_context>
chip_gen: v5e
topology: v5e:2x2
jax: 0.10.0
libtpu: 0.0.40
codegen_flags: <defaults>
</compile_context>

<pallas_src>
import math

import jax
import jax.numpy as jnp
from jax.experimental import pallas as pl
from jax.experimental.pallas import tpu as pltpu

# Logical (PyTorch) dims and lane-padded kernel dims.
D_IN = 21
H1, H2, D_OUT = 21 * 100, 21 * 10, 1          # 2100, 210, 1
H1P, H2P = 2176, 256                          # 17*128, 2*128

H1_CHUNK = 512                                # layer-1/2 fusion chunk (128-mult)
TB_MAX = 1024                                 # batch tile upper bound (sweep 512..2048)
VMEM_LIMIT_BYTES = 48 * 1024 * 1024           # explicit scoped-VMEM budget (v7x-safe)


def _round_up(n, m):
    return ((n + m - 1) // m) * m


def _pad_to(a, shape):
    pads = [(0, s - d) for d, s in zip(a.shape, shape)]
    return jnp.pad(a, pads)


def _select_tb(B, tb_max=TB_MAX):
    """Batch tile: multiple of 8, as large as feasible, but keep >=4 grid steps
    on big batches so ("parallel",) can shard across v7x's two TensorCores."""
    tb = min(tb_max, _round_up(B, 8))
    if B > tb_max:
        tb = min(tb, max(256, _round_up(-(-B // 4), 8)))
    return max(tb, 8)


def mlp_kernel(x_ref, w1_ref, b1_ref, w2_ref, b2_ref, w3_ref, b3_ref, o_ref):
    # x tile, cast to bf16 for the MXU (no-op if already bf16).
    x = x_ref[...].astype(jnp.bfloat16)
    tb = x.shape[0]

    # Layers 1+2 fused over H1P chunks: the full [tb, 2176] hidden activation is
    # never materialized.  Dropout = identity (eval mode).
    acc2 = jnp.zeros((tb, H2P), jnp.float32)
    for c0 in range(0, H1P, H1_CHUNK):
        c1 = min(c0 + H1_CHUNK, H1P)
        h1c = jnp.dot(x, w1_ref[:, c0:c1], preferred_element_type=jnp.float32)
        h1c = jnp.maximum(h1c + b1_ref[:, c0:c1], 0.0)        # bias + ReLU (f32 VPU)
        acc2 = acc2 + jnp.dot(h1c.astype(jnp.bfloat16), w2_ref[c0:c1, :],
                              preferred_element_type=jnp.float32)
    h2 = jnp.maximum(acc2 + b2_ref[...], 0.0)                 # bias + ReLU

    # Layer 3: Linear(256 padded -> 1) as VPU multiply + lane reduction (no MXU),
    # scalar bias from SMEM, sigmoid on the EUP.
    logits = jnp.sum(h2 * w3_ref[...], axis=-1, keepdims=True) + b3_ref[0, 0]
    o_ref[...] = jax.nn.sigmoid(logits)


def mynet_forward(x, params, tb_max=TB_MAX):
    """x: [B, 21] float32 (or bfloat16); params from init_params()[0].
    Returns [B, 1] float32."""
    w1, b1, w2, b2, w3, b3 = params
    B = x.shape[0]

    tb = _select_tb(B, tb_max)
    b_pad = _round_up(B, tb)
    if b_pad != B:
        x = jnp.pad(x, ((0, b_pad - B), (0, 0)))
    grid = (b_pad // tb,)

    # Weights/biases: constant index_map (DMA'd once, VMEM-resident) and
    # single-buffered -> no wasted second copy.
    resident = dict(pipeline_mode=pl.Buffered(1))

    out = pl.pallas_call(
        mlp_kernel,
        out_shape=jax.ShapeDtypeStruct((b_pad, 1), jnp.float32),
        grid=grid,
        in_specs=[
            pl.BlockSpec((tb, D_IN), lambda i: (i, 0)),                  # x tile (streamed)
            pl.BlockSpec((D_IN, H1P), lambda i: (0, 0), **resident),     # w1 (bf16)
            pl.BlockSpec((1, H1P), lambda i: (0, 0), **resident),        # b1 (f32)
            pl.BlockSpec((H1P, H2P), lambda i: (0, 0), **resident),      # w2 (bf16)
            pl.BlockSpec((1, H2P), lambda i: (0, 0), **resident),        # b2 (f32)
            pl.BlockSpec((1, H2P), lambda i: (0, 0), **resident),        # w3 row (f32)
            pl.BlockSpec(memory_space=pltpu.MemorySpace.SMEM),           # b3 scalar
        ],
        out_specs=pl.BlockSpec((tb, 1), lambda i: (i, 0)),
        compiler_params=pltpu.CompilerParams(
            dimension_semantics=("parallel",),
            vmem_limit_bytes=VMEM_LIMIT_BYTES,
        ),
    )(x, w1, b1, w2, b2, w3, b3)

    return out[:B]


def xavier_uniform(key, fan_in, fan_out):
    bound = math.sqrt(6.0 / (fan_in + fan_out))
    # stored as [in, out] so the kernel computes x @ W
    return jax.random.uniform(key, (fan_in, fan_out), jnp.float32, -bound, bound)


def linear_bias(key, fan_in, fan_out):
    # PyTorch nn.Linear default bias init: U(-1/sqrt(fan_in), 1/sqrt(fan_in))
    bound = 1.0 / math.sqrt(fan_in)
    return jax.random.uniform(key, (1, fan_out), jnp.float32, -bound, bound)


def init_params(key):
    ks = jax.random.split(key, 6)
    w1 = xavier_uniform(ks[0], D_IN, H1)
    b1 = linear_bias(ks[1], D_IN, H1)
    w2 = xavier_uniform(ks[2], H1, H2)
    b2 = linear_bias(ks[3], H1, H2)
    w3 = xavier_uniform(ks[4], H2, D_OUT)
    b3 = linear_bias(ks[5], H2, D_OUT)
    f32_params = (w1, b1, w2, b2, w3, b3)

    # Zero-pad to lane-friendly dims; weights stored bf16, biases f32.
    w1p = _pad_to(w1, (D_IN, H1P)).astype(jnp.bfloat16)
    b1p = _pad_to(b1, (1, H1P))
    w2p = _pad_to(w2, (H1P, H2P)).astype(jnp.bfloat16)
    b2p = _pad_to(b2, (1, H2P))
    w3p = _pad_to(w3.T, (1, H2P))          # (1, 256) row, f32 for the VPU reduce
    b3p = b3                               # (1, 1) f32, lives in SMEM
    return (w1p, b1p, w2p, b2p, w3p, b3p), f32_params


def reference_forward_bf16(x, params):
    """Pure-JAX reference using the exact same (bf16-stored) params/math."""
    w1, b1, w2, b2, w3, b3 = params
    xb = x.astype(jnp.bfloat16)
    h1 = jnp.maximum(jnp.dot(xb, w1, preferred_element_type=jnp.float32) + b1, 0.0)
    h2 = jnp.maximum(
        jnp.dot(h1.astype(jnp.bfloat16), w2, preferred_element_type=jnp.float32) + b2,
        0.0,
    )
    logits = jnp.sum(h2 * w3, axis=-1, keepdims=True) + b3[0, 0]
    return jax.nn.sigmoid(logits)


def reference_forward_f32(x, f32_params):
    """Full-f32 reference matching the original PyTorch MyNet (eval mode)."""
    w1, b1, w2, b2, w3, b3 = f32_params
    hi = jax.lax.Precision.HIGHEST
    h1 = jnp.maximum(jnp.dot(x, w1, precision=hi) + b1, 0.0)
    h2 = jnp.maximum(jnp.dot(h1, w2, precision=hi) + b2, 0.0)
    return jax.nn.sigmoid(jnp.dot(h2, w3, precision=hi) + b3)


if __name__ == "__main__":
    key = jax.random.PRNGKey(0)
    k_params, k_x = jax.random.split(key)
    params, f32_params = init_params(k_params)

    # B=8: single tile; B=300: padded odd batch; B=4096: tb=1024 with a
    # 4-step grid (exercises the large-tile + megacore-shardable path).
    for B in (8, 300, 4096):
        x = jax.random.normal(jax.random.fold_in(k_x, B), (B, D_IN), jnp.float32)

        out = jax.block_until_ready(mynet_forward(x, params))
        assert out.shape == (B, 1)

        ref_bf16 = reference_forward_bf16(x, params)
        assert jnp.allclose(out, ref_bf16, atol=1e-3, rtol=1e-3), (
            f"bf16-ref mismatch at B={B}: max |diff| = "
            f"{jnp.max(jnp.abs(out - ref_bf16))}"
        )

        ref_f32 = reference_forward_f32(x, f32_params)
        assert jnp.allclose(out, ref_f32, atol=5e-2), (
            f"f32-ref mismatch at B={B}: max |diff| = "
            f"{jnp.max(jnp.abs(out - ref_f32))}"
        )

    print("KERNEL_OK")
</pallas_src>

<mosaic_0001>
module attributes {stable_mosaic.version = 11 : i64} {
  func.func @mlp_kernel(%arg0: i32, %arg1: memref<8x21xf32, #tpu.memory_space<vmem>>, %arg2: memref<21x2176xbf16, #tpu.memory_space<vmem>>, %arg3: memref<1x2176xf32, #tpu.memory_space<vmem>>, %arg4: memref<2176x256xbf16, #tpu.memory_space<vmem>>, %arg5: memref<1x256xf32, #tpu.memory_space<vmem>>, %arg6: memref<1x256xf32, #tpu.memory_space<vmem>>, %arg7: memref<1x1xf32, #tpu.memory_space<smem>>, %arg8: memref<8x1xf32, #tpu.memory_space<vmem>>) attributes {dimension_semantics = [#tpu.dimension_semantics<parallel>], iteration_bounds = array<i64: 1>, scalar_prefetch = 0 : i64, scratch_operands = 0 : i64, tpu.core_type = #tpu.core_type<tc>, window_params = [{transform_indices = @transform_0, window_bounds = array<i64: 8, 21>}, {pipeline_mode = #tpu.pipeline_mode<synchronous>, transform_indices = @transform_1, window_bounds = array<i64: 21, 2176>}, {pipeline_mode = #tpu.pipeline_mode<synchronous>, transform_indices = @transform_2, window_bounds = array<i64: 1, 2176>}, {pipeline_mode = #tpu.pipeline_mode<synchronous>, transform_indices = @transform_3, window_bounds = array<i64: 2176, 256>}, {pipeline_mode = #tpu.pipeline_mode<synchronous>, transform_indices = @transform_4, window_bounds = array<i64: 1, 256>}, {pipeline_mode = #tpu.pipeline_mode<synchronous>, transform_indices = @transform_5, window_bounds = array<i64: 1, 256>}, {transform_indices = @transform_6, window_bounds = array<i64: 1, 1>}, {transform_indices = @transform_7, window_bounds = array<i64: 8, 1>}]} {
    %c0 = arith.constant 0 : index
    %c0_0 = arith.constant 0 : index
    %0 = vector.load %arg1[%c0, %c0_0] : memref<8x21xf32, #tpu.memory_space<vmem>>, vector<8x21xf32>
    %1 = arith.truncf %0 : vector<8x21xf32> to vector<8x21xbf16>
    %cst = arith.constant 0.000000e+00 : f32
    %2 = vector.broadcast %cst : f32 to vector<8x256xf32>
    %c0_1 = arith.constant 0 : index
    %c0_2 = arith.constant 0 : index
    %3 = vector.load %arg2[%c0_1, %c0_2] : memref<21x2176xbf16, #tpu.memory_space<vmem>>, vector<21x512xbf16>
    %cst_3 = arith.constant dense<0.000000e+00> : vector<8x512xf32>
    %4 = tpu.matmul %1, %3, %cst_3 {dimension_numbers = #tpu.dot_dimension_numbers<[1], [0], [0], [1], [0, 0, 1, 1], [], []>} : vector<8x21xbf16>, vector<21x512xbf16>, vector<8x512xf32> -> vector<8x512xf32>
    %c0_4 = arith.constant 0 : index
    %c0_5 = arith.constant 0 : index
    %5 = vector.load %arg3[%c0_4, %c0_5] : memref<1x2176xf32, #tpu.memory_space<vmem>>, vector<1x512xf32>
    %6 = vector.broadcast %5 : vector<1x512xf32> to vector<8x512xf32>
    %7 = arith.addf %4, %6 : vector<8x512xf32>
    %cst_6 = arith.constant 0.000000e+00 : f32
    %8 = vector.broadcast %cst_6 : f32 to vector<8x512xf32>
    %9 = arith.maximumf %7, %8 : vector<8x512xf32>
    %10 = arith.truncf %9 : vector<8x512xf32> to vector<8x512xbf16>
    %c0_7 = arith.constant 0 : index
    %c0_8 = arith.constant 0 : index
    %11 = vector.load %arg4[%c0_7, %c0_8] : memref<2176x256xbf16, #tpu.memory_space<vmem>>, vector<512x256xbf16>
    %cst_9 = arith.constant dense<0.000000e+00> : vector<8x256xf32>
    %12 = tpu.matmul %10, %11, %cst_9 {dimension_numbers = #tpu.dot_dimension_numbers<[1], [0], [0], [1], [0, 0, 1, 1], [], []>} : vector<8x512xbf16>, vector<512x256xbf16>, vector<8x256xf32> -> vector<8x256xf32>
    %13 = arith.addf %2, %12 : vector<8x256xf32>
    %c0_10 = arith.constant 0 : index
    %c512 = arith.constant 512 : index
    %14 = vector.load %arg2[%c0_10, %c512] : memref<21x2176xbf16, #tpu.memory_space<vmem>>, vector<21x512xbf16>
    %cst_11 = arith.constant dense<0.000000e+00> : vector<8x512xf32>
    %15 = tpu.matmul %1, %14, %cst_11 {dimension_numbers = #tpu.dot_dimension_numbers<[1], [0], [0], [1], [0, 0, 1, 1], [], []>} : vector<8x21xbf16>, vector<21x512xbf16>, vector<8x512xf32> -> vector<8x512xf32>
    %c0_12 = arith.constant 0 : index
    %c512_13 = arith.constant 512 : index
    %16 = vector.load %arg3[%c0_12, %c512_13] : memref<1x2176xf32, #tpu.memory_space<vmem>>, vector<1x512xf32>
    %17 = vector.broadcast %16 : vector<1x512xf32> to vector<8x512xf32>
    %18 = arith.addf %15, %17 : vector<8x512xf32>
    %cst_14 = arith.constant 0.000000e+00 : f32
    %19 = vector.broadcast %cst_14 : f32 to vector<8x512xf32>
    %20 = arith.maximumf %18, %19 : vector<8x512xf32>
    %21 = arith.truncf %20 : vector<8x512xf32> to vector<8x512xbf16>
    %c512_15 = arith.constant 512 : index
    %c0_16 = arith.constant 0 : index
    %22 = vector.load %arg4[%c512_15, %c0_16] : memref<2176x256xbf16, #tpu.memory_space<vmem>>, vector<512x256xbf16>
    %cst_17 = arith.constant dense<0.000000e+00> : vector<8x256xf32>
    %23 = tpu.matmul %21, %22, %cst_17 {dimension_numbers = #tpu.dot_dimension_numbers<[1], [0], [0], [1], [0, 0, 1, 1], [], []>} : vector<8x512xbf16>, vector<512x256xbf16>, vector<8x256xf32> -> vector<8x256xf32>
    %24 = arith.addf %13, %23 : vector<8x256xf32>
    %c0_18 = arith.constant 0 : index
    %c1024 = arith.constant 1024 : index
    %25 = vector.load %arg2[%c0_18, %c1024] : memref<21x2176xbf16, #tpu.memory_space<vmem>>, vector<21x512xbf16>
    %cst_19 = arith.constant dense<0.000000e+00> : vector<8x512xf32>
    %26 = tpu.matmul %1, %25, %cst_19 {dimension_numbers = #tpu.dot_dimension_numbers<[1], [0], [0], [1], [0, 0, 1, 1], [], []>} : vector<8x21xbf16>, vector<21x512xbf16>, vector<8x512xf32> -> vector<8x512xf32>
    %c0_20 = arith.constant 0 : index
    %c1024_21 = arith.constant 1024 : index
    %27 = vector.load %arg3[%c0_20, %c1024_21] : memref<1x2176xf32, #tpu.memory_space<vmem>>, vector<1x512xf32>
    %28 = vector.broadcast %27 : vector<1x512xf32> to vector<8x512xf32>
    %29 = arith.addf %26, %28 : vector<8x512xf32>
    %cst_22 = arith.constant 0.000000e+00 : f32
    %30 = vector.broadcast %cst_22 : f32 to vector<8x512xf32>
    %31 = arith.maximumf %29, %30 : vector<8x512xf32>
    %32 = arith.truncf %31 : vector<8x512xf32> to vector<8x512xbf16>
    %c1024_23 = arith.constant 1024 : index
    %c0_24 = arith.constant 0 : index
    %33 = vector.load %arg4[%c1024_23, %c0_24] : memref<2176x256xbf16, #tpu.memory_space<vmem>>, vector<512x256xbf16>
    %cst_25 = arith.constant dense<0.000000e+00> : vector<8x256xf32>
    %34 = tpu.matmul %32, %33, %cst_25 {dimension_numbers = #tpu.dot_dimension_numbers<[1], [0], [0], [1], [0, 0, 1, 1], [], []>} : vector<8x512xbf16>, vector<512x256xbf16>, vector<8x256xf32> -> vector<8x256xf32>
    %35 = arith.addf %24, %34 : vector<8x256xf32>
    %c0_26 = arith.constant 0 : index
    %c1536 = arith.constant 1536 : index
    %36 = vector.load %arg2[%c0_26, %c1536] : memref<21x2176xbf16, #tpu.memory_space<vmem>>, vector<21x512xbf16>
    %cst_27 = arith.constant dense<0.000000e+00> : vector<8x512xf32>
    %37 = tpu.matmul %1, %36, %cst_27 {dimension_numbers = #tpu.dot_dimension_numbers<[1], [0], [0], [1], [0, 0, 1, 1], [], []>} : vector<8x21xbf16>, vector<21x512xbf16>, vector<8x512xf32> -> vector<8x512xf32>
    %c0_28 = arith.constant 0 : index
    %c1536_29 = arith.constant 1536 : index
    %38 = vector.load %arg3[%c0_28, %c1536_29] : memref<1x2176xf32, #tpu.memory_space<vmem>>, vector<1x512xf32>
    %39 = vector.broadcast %38 : vector<1x512xf32> to vector<8x512xf32>
    %40 = arith.addf %37, %39 : vector<8x512xf32>
    %cst_30 = arith.constant 0.000000e+00 : f32
    %41 = vector.broadcast %cst_30 : f32 to vector<8x512xf32>
    %42 = arith.maximumf %40, %41 : vector<8x512xf32>
    %43 = arith.truncf %42 : vector<8x512xf32> to vector<8x512xbf16>
    %c1536_31 = arith.constant 1536 : index
    %c0_32 = arith.constant 0 : index
    %44 = vector.load %arg4[%c1536_31, %c0_32] : memref<2176x256xbf16, #tpu.memory_space<vmem>>, vector<512x256xbf16>
    %cst_33 = arith.constant dense<0.000000e+00> : vector<8x256xf32>
    %45 = tpu.matmul %43, %44, %cst_33 {dimension_numbers = #tpu.dot_dimension_numbers<[1], [0], [0], [1], [0, 0, 1, 1], [], []>} : vector<8x512xbf16>, vector<512x256xbf16>, vector<8x256xf32> -> vector<8x256xf32>
    %46 = arith.addf %35, %45 : vector<8x256xf32>
    %c0_34 = arith.constant 0 : index
    %c2048 = arith.constant 2048 : index
    %47 = vector.load %arg2[%c0_34, %c2048] : memref<21x2176xbf16, #tpu.memory_space<vmem>>, vector<21x128xbf16>
    %cst_35 = arith.constant dense<0.000000e+00> : vector<8x128xf32>
    %48 = tpu.matmul %1, %47, %cst_35 {dimension_numbers = #tpu.dot_dimension_numbers<[1], [0], [0], [1], [0, 0, 1, 1], [], []>} : vector<8x21xbf16>, vector<21x128xbf16>, vector<8x128xf32> -> vector<8x128xf32>
    %c0_36 = arith.constant 0 : index
    %c2048_37 = arith.constant 2048 : index
    %49 = vector.load %arg3[%c0_36, %c2048_37] : memref<1x2176xf32, #tpu.memory_space<vmem>>, vector<1x128xf32>
    %50 = vector.broadcast %49 : vector<1x128xf32> to vector<8x128xf32>
    %51 = arith.addf %48, %50 : vector<8x128xf32>
    %cst_38 = arith.constant 0.000000e+00 : f32
    %52 = vector.broadcast %cst_38 : f32 to vector<8x128xf32>
    %53 = arith.maximumf %51, %52 : vector<8x128xf32>
    %54 = arith.truncf %53 : vector<8x128xf32> to vector<8x128xbf16>
    %c2048_39 = arith.constant 2048 : index
    %c0_40 = arith.constant 0 : index
    %55 = vector.load %arg4[%c2048_39, %c0_40] : memref<2176x256xbf16, #tpu.memory_space<vmem>>, vector<128x256xbf16>
    %cst_41 = arith.constant dense<0.000000e+00> : vector<8x256xf32>
    %56 = tpu.matmul %54, %55, %cst_41 {dimension_numbers = #tpu.dot_dimension_numbers<[1], [0], [0], [1], [0, 0, 1, 1], [], []>} : vector<8x128xbf16>, vector<128x256xbf16>, vector<8x256xf32> -> vector<8x256xf32>
    %57 = arith.addf %46, %56 : vector<8x256xf32>
    %c0_42 = arith.constant 0 : index
    %c0_43 = arith.constant 0 : index
    %58 = vector.load %arg5[%c0_42, %c0_43] : memref<1x256xf32, #tpu.memory_space<vmem>>, vector<1x256xf32>
    %59 = vector.broadcast %58 : vector<1x256xf32> to vector<8x256xf32>
    %60 = arith.addf %57, %59 : vector<8x256xf32>
    %cst_44 = arith.constant 0.000000e+00 : f32
    %61 = vector.broadcast %cst_44 : f32 to vector<8x256xf32>
    %62 = arith.maximumf %60, %61 : vector<8x256xf32>
    %c0_45 = arith.constant 0 : index
    %c0_46 = arith.constant 0 : index
    %63 = vector.load %arg6[%c0_45, %c0_46] : memref<1x256xf32, #tpu.memory_space<vmem>>, vector<1x256xf32>
    %64 = vector.broadcast %63 : vector<1x256xf32> to vector<8x256xf32>
    %65 = arith.mulf %62, %64 : vector<8x256xf32>
    %cst_47 = arith.constant dense<0.000000e+00> : vector<8xf32>
    %66 = vector.multi_reduction <add>, %65, %cst_47 [1] : vector<8x256xf32> to vector<8xf32>
    %67 = vector.shape_cast %66 : vector<8xf32> to vector<8x1xf32>
    %c0_48 = arith.constant 0 : index
    %c0_49 = arith.constant 0 : index
    %68 = memref.load %arg7[%c0_48, %c0_49] : memref<1x1xf32, #tpu.memory_space<smem>>
    %69 = vector.broadcast %68 : f32 to vector<8x1xf32>
    %70 = arith.addf %67, %69 : vector<8x1xf32>
    %71 = arith.negf %70 : vector<8x1xf32>
    %72 = math.exp %71 : vector<8x1xf32>
    %cst_50 = arith.constant 1.000000e+00 : f32
    %73 = vector.broadcast %cst_50 : f32 to vector<8x1xf32>
    %74 = arith.addf %73, %72 : vector<8x1xf32>
    %75 = arith.divf %73, %74 : vector<8x1xf32>
    %c0_51 = arith.constant 0 : index
    %c0_52 = arith.constant 0 : index
    %76 = vector.load %arg8[%c0_51, %c0_52] : memref<8x1xf32, #tpu.memory_space<vmem>>, vector<8x1xf32>
    tpu.vector_store %arg8[%c0_51, %c0_52], %75 {strides = array<i32>} : memref<8x1xf32, #tpu.memory_space<vmem>>, vector<8x1xf32>,
    return
  }
  func.func @transform_0(%arg0: i32) -> (i32, i32) {
    %c0_i32 = arith.constant 0 : i32
    %c0_i32_0 = arith.constant 0 : i32
    return %arg0, %c0_i32 : i32, i32
  }
  func.func @transform_1(%arg0: i32) -> (i32, i32) {
    %c0_i32 = arith.constant 0 : i32
    %c0_i32_0 = arith.constant 0 : i32
    %c0_i32_1 = arith.constant 0 : i32
    return %c0_i32, %c0_i32_0 : i32, i32
  }
  func.func @transform_2(%arg0: i32) -> (i32, i32) {
    %c0_i32 = arith.constant 0 : i32
    %c0_i32_0 = arith.constant 0 : i32
    %c0_i32_1 = arith.constant 0 : i32
    return %c0_i32, %c0_i32_0 : i32, i32
  }
  func.func @transform_3(%arg0: i32) -> (i32, i32) {
    %c0_i32 = arith.constant 0 : i32
    %c0_i32_0 = arith.constant 0 : i32
    %c0_i32_1 = arith.constant 0 : i32
    return %c0_i32, %c0_i32_0 : i32, i32
  }
  func.func @transform_4(%arg0: i32) -> (i32, i32) {
    %c0_i32 = arith.constant 0 : i32
    %c0_i32_0 = arith.constant 0 : i32
    %c0_i32_1 = arith.constant 0 : i32
    return %c0_i32, %c0_i32_0 : i32, i32
  }
  func.func @transform_5(%arg0: i32) -> (i32, i32) {
    %c0_i32 = arith.constant 0 : i32
    %c0_i32_0 = arith.constant 0 : i32
    %c0_i32_1 = arith.constant 0 : i32
    return %c0_i32, %c0_i32_0 : i32, i32
  }
  func.func @transform_6(%arg0: i32) -> (i32, i32) {
    %c0_i32 = arith.constant 0 : i32
    %c0_i32_0 = arith.constant 0 : i32
    %c0_i32_1 = arith.constant 0 : i32
    return %c0_i32, %c0_i32_0 : i32, i32
  }
  func.func @transform_7(%arg0: i32) -> (i32, i32) {
    %c0_i32 = arith.constant 0 : i32
    %c0_i32_0 = arith.constant 0 : i32
    return %arg0, %c0_i32 : i32, i32
  }
}

</mosaic_0001>

<bundles_post_ra>
// kernel: tpu_custom_call.1
= control target key start
LH: loop header
LB: loop body
LE: loop exit
PB: predicated region body
PF: predicated region fallthrough
CT: control target
= control target key end

     0   :  { %13 = vsyncpa [#allocation4], 0  ;;  %s4622_s0 = inlined_call_operand.hbm [shape: f32[8,21], index: 0, kind: input, shape index: {}]   ;;  %s4623_s1 = inlined_call_operand.hbm [shape: bf16[21,2176], index: 1, kind: input, shape index: {}]   ;;  %s4624_s2 = inlined_call_operand.hbm [shape: f32[1,2176], index: 2, kind: input, shape index: {}]   ;;  %s4625_s3 = inlined_call_operand.hbm [shape: bf16[2176,256], index: 3, kind: input, shape index: {}]   ;;  %s4626_s4 = inlined_call_operand.hbm [shape: f32[1,256], index: 4, kind: input, shape index: {}]   ;;  %s4627_s5 = inlined_call_operand.hbm [shape: f32[1,256], index: 5, kind: input, shape index: {}]   ;;  %s4628_s6 = inlined_call_operand.<no memory space> [shape: f32[1,1], index: 6, kind: input, shape index: {}]   ;;  %s4629_s7 = inlined_call_operand.vmem [shape: f32[8,1], index: 7, kind: output, shape index: {}]  }
   0x1   :  { %14 = vsyncpa [#allocation6], 0 }
   0x2   :  { %15 = vsyncpa [#allocation9], 0  ;;  %s32_s26 = sshll.u32 %s4623_s1, 4  ;;  %s33_s26 = int_to_ptr.hbm [resolvable:$true] %s32_s26 }
   0x3   :  { %16 = vsyncpa [#allocation12], 0  ;;  %s4394_s27 = smov [#allocation5]   ;;  %s56_s8 = sshll.u32 %s4625_s3, 4  ;;  %s57_s8 = int_to_ptr.hbm [resolvable:$true] %s56_s8 }
   0x4   :  { %s34_s28 = sshll.u32 %s4394_s27, 4  ;;  %s4395_s9 = smov 1088   ;;  %s35_s28 = int_to_ptr.vmem [resolvable:$true] %s34_s28 }
   0x5   :  { %s4396_s10 = smov 68   ;;  %s4397_s11 = smov [#allocation8]  }
   0x6   :  { %40 = dma.hbm_to_vmem [thread:$0]  %s33_s26, 3264, %s35_s28, [#allocation6], %s4395_s9, %s4395_s9, %s4396_s10  }
   0x7   :  { %s58_s12 = sshll.u32 %s4397_s11, 4  ;;  %s4398_s13 = smov 128   ;;  %s59_s12 = int_to_ptr.vmem [resolvable:$true] %s58_s12 }
   0x8   :  { %s4399_s14 = smov 8   ;;  %s22_s16 = sshll.u32 %s4622_s0, 4  ;;  %s23_s16 = int_to_ptr.hbm [resolvable:$true] %s22_s16 }
   0x9   :  { %64 = dma.hbm_to_vmem [thread:$0]  %s57_s8, 34816, %s59_s12, [#allocation9], %s4398_s13, %s4398_s13, %s4399_s14  }
   0xa   :  { %s4400_s17 = smov [#allocation3]   ;;  %s46_s20 = sshll.u32 %s4624_s2, 4  ;;  %s47_s20 = int_to_ptr.hbm [resolvable:$true] %s46_s20 }
   0xb   :  { %s24_s18 = sshll.u32 %s4400_s17, 4  ;;  %s4401_s21 = smov [#allocation7]   ;;  %s25_s18 = int_to_ptr.vmem [resolvable:$true] %s24_s18 }
   0xc   :  { %27 = dma.hbm_to_vmem [thread:$0]  %s23_s16, 128, %s25_s18, [#allocation4]  }
   0xd   :  { %s48_s22 = sshll.u32 %s4401_s21, 4  ;;  %s70_s25 = sshll.u32 %s4626_s4, 4  ;;  %s49_s22 = int_to_ptr.vmem [resolvable:$true] %s48_s22  ;;  %s71_s25 = int_to_ptr.hbm [resolvable:$true] %s70_s25 }
   0xe   :  { %51 = dma.hbm_to_vmem [thread:$0]  %s47_s20, 272, %s49_s22, [#allocation6]  }
   0xf   :  { %s81_s27 = sshll.u32 %s4627_s5, 4  ;;  %s4402_s28 = smov [#allocation10]   ;;  %s82_s27 = int_to_ptr.hbm [resolvable:$true] %s81_s27 }
  0x10   :  { %s72_s29 = sshll.u32 %s4402_s28, 4  ;;  %s4403_s2 = smov [#allocation11]   ;;  %s73_s29 = int_to_ptr.vmem [resolvable:$true] %s72_s29 }
  0x11   :  { %75 = dma.hbm_to_vmem [thread:$0]  %s71_s25, 32, %s73_s29, [#allocation9]  }
  0x12   :  { %s83_s30 = sshll.u32 %s4403_s2, 4  ;;  %s84_s30 = int_to_ptr.vmem [resolvable:$true] %s83_s30 }
  0x13   :  { %86 = dma.hbm_to_vmem [thread:$0]  %s82_s27, 32, %s84_s30, [#allocation12]  }
  0x14   :  { %4386 = dma.done.wait [#allocation4], 128  }
  0x15   :  { %4387 = vsyncadd [#allocation4], 4294967168 }
  0x16   :  { %4388 = dma.done.wait [#allocation6], 3536  }
  0x17   :  { %4389 = vsyncadd [#allocation6], 4294963760 }
  0x18   :  { %4390 = dma.done.wait [#allocation9], 34848  }
  0x19   :  { %4391 = vsyncadd [#allocation9], 4294932448 }
  0x1a   :  { %4392 = dma.done.wait [#allocation12], 32  }
  0x1b   :  { %4393 = vsyncadd [#allocation12], 4294967264  ;;  %vm166_vm0 = vcmask 1041408   ;;  %vm167_vm1 = vcmask 1042432   ;;  %v4404_v0 = vmov 65535   ;;  %v114_v32 = vld [vmem:[#allocation3] sm:$0xff] }
  0x1c   :  { %v168_v1 = vsel %vm166_vm0, 4294967295, %v4404_v0  ;;  %v120_v2 = vld [vmem:[#allocation5 + $0x88] sm:$0x77]  ;;  %v121_v3 = vld [vmem:[#allocation5 + $0x90] sm:$0x77]  ;;  %v4472_v44 = vpack.c.bf16 %v114_v32, %v114_v32  ;;  %vm162_vm2 = vcmask 171008  }
  0x1d   :  { %v146_v4 = vunpack.c.l.b16 %v120_v2  ;;  %v147_v5 = vunpack.c.h.b16 %v120_v2  ;;  %v148_v6 = vunpack.c.l.b16 %v121_v3  ;;  %v149_v7 = vunpack.c.h.b16 %v121_v3  ;;  %v2765_v12 = vld [vmem:[#allocation5] sm:$0xf]  ;;  %v310_v13 = vld [vmem:[#allocation5 + $0x98] sm:$0x77]  ;;  %v3939_v15 = vld [vmem:[#allocation5 + $0x40] sm:$0xf0] }
  0x1e   :  { %v4463_v8 = vsel %vm167_vm1, %v168_v1, 0  ;;  %v311_v14 = vld [vmem:[#allocation5 + $0xa0] sm:$0x77]  ;;  %v2767_v17 = vld [vmem:[#allocation5 + $0x44] sm:$0xf0]  ;;  %v336_v19 = vunpack.c.l.b16 %v310_v13  ;;  %v337_v20 = vunpack.c.h.b16 %v310_v13  ;;  %v2766_v30 = vor.u32 %v3939_v15, %v2765_v12 }
  0x1f   :  { %v154_v9 = vpack.c.b16 %v146_v4, %v146_v4  ;;  %v155_v10 = vpack.c.b16 %v147_v5, %v147_v5  ;;  %v156_v11 = vpack.c.b16 %v148_v6, %v148_v6  ;;  %v3937_v16 = vld [vmem:[#allocation5 + $0x4] sm:$0xf]  ;;  %v157_v18 = vpack.c.b16 %v149_v7, %v149_v7  ;;  %v2773_v24 = vld [vmem:[#allocation5 + $0x8] sm:$0xf]  ;;  %v3940_v25 = vld [vmem:[#allocation5 + $0x48] sm:$0xf0] }
  0x20   :  { %v338_v26 = vunpack.c.l.b16 %v311_v14  ;;  %v344_v27 = vpack.c.b16 %v336_v19, %v336_v19  ;;  %v345_v28 = vpack.c.b16 %v337_v20, %v337_v20  ;;  %v339_v29 = vunpack.c.h.b16 %v311_v14  ;;  %v4005_v37 = vld [vmem:[#allocation5 + $0x14] sm:$0xf]  ;;  %v2787_v38 = vld [vmem:[#allocation5 + $0x54] sm:$0xf0]  ;;  %v3938_v41 = vld [vmem:[#allocation5 + $0xc] sm:$0xf] }
  0x21   :  { %v171_v21 = vand.u32 %v4463_v8, %v154_v9  ;;  %v174_v22 = vand.u32 %v4463_v8, %v155_v10  ;;  %v177_v23 = vand.u32 %v4463_v8, %v156_v11  ;;  %v2770_v31 = vor.u32 %v3937_v16, %v2767_v17  ;;  %v2775_v42 = vld [vmem:[#allocation5 + $0x4c] sm:$0xf0]  ;;  %v4007_v46 = vld [vmem:[#allocation5 + $0x50] sm:$0xf0]  ;;  %v2793_v47 = vld [vmem:[#allocation5 + $0x18] sm:$0xf] }
  0x22   :  { %v346_v33 = vpack.c.b16 %v338_v26, %v338_v26  ;;  %v2774_v34 = vor.u32 %v3940_v25, %v2773_v24  ;;  %v180_v35 = vand.u32 %v4463_v8, %v157_v18  ;;  %v356_v36 = vand.u32 %v345_v28, %v4463_v8  ;;  %v2785_v43 = vld [vmem:[#allocation5 + $0x10] sm:$0xf]  ;;  %v4008_v48 = vld [vmem:[#allocation5 + $0x58] sm:$0xf0]  ;;  %v2795_v54 = vld [vmem:[#allocation5 + $0x5c] sm:$0xf0] }
  0x23   :  { %188 = vmatpush.bf16.msra.mxu0 %v171_v21  ;;  %201 = vmatpush.bf16.msra.mxu3 %v174_v22  ;;  %v353_v39 = vand.u32 %v344_v27, %v4463_v8  ;;  %v347_v45 = vpack.c.b16 %v339_v29, %v339_v29  ;;  %v2790_v49 = vor.u32 %v4005_v37, %v2787_v38  ;;  %v4006_v53 = vld [vmem:[#allocation5 + $0x1c] sm:$0xf]  ;;  %v2861_v56 = vld [vmem:[#allocation8 + $0x270] sm:$0xf]  ;;  %v4024_v57 = vld [vmem:[#allocation8 + $0x274] sm:$0xf0] }
  0x24   :  { %214 = vmatpush.bf16.msra.mxu2 %v177_v23  ;;  %v359_v40 = vand.u32 %v346_v33, %v4463_v8  ;;  %383 = vmatpush.bf16.msra.mxu1 %v356_v36  ;;  %v2778_v50 = vor.u32 %v3938_v41, %v2775_v42  ;;  %v2786_v51 = vor.u32 %v4007_v46, %v2785_v43  ;;  %v2925_v58 = vld [vmem:[#allocation8 + $0x2f0] sm:$0xf]  ;;  %v4040_v60 = vld [vmem:[#allocation8 + $0x2f4] sm:$0xf0]  ;;  %v2853_v61 = vld [vmem:[#allocation8 + $0x260] sm:$0xf] }
  0x25   :  { %v2794_v52 = vor.u32 %v4008_v48, %v2793_v47  ;;  %v362_v55 = vand.u32 %v347_v45, %v4463_v8  ;;  %v2862_v59 = vor.u32 %v4024_v57, %v2861_v56  ;;  %v4022_v62 = vld [vmem:[#allocation8 + $0x264] sm:$0xf0]  ;;  %v2926_v63 = vor.u32 %v4040_v60, %v2925_v58  ;;  %v2917_v0 = vld [vmem:[#allocation8 + $0x2e0] sm:$0xf]  ;;  %v2989_v2 = vld [vmem:[#allocation8 + $0x370] sm:$0xf] }
  0x26   :  { %v4038_v1 = vld [vmem:[#allocation8 + $0x2e4] sm:$0xf0]  ;;  %v4056_v3 = vld [vmem:[#allocation8 + $0x374] sm:$0xf0]  ;;  %v2798_v4 = vor.u32 %v4006_v53, %v2795_v54  ;;  %v2981_v6 = vld [vmem:[#allocation8 + $0x360] sm:$0xf]  ;;  %v2854_v7 = vor.u32 %v4022_v62, %v2853_v61 }
  0x27   :  { %189 = vmatpush.bf16.msra.mxu0 %v2766_v30  ;;  %202 = vmatpush.bf16.msra.mxu3 %v2770_v31  ;;  %v2990_v5 = vor.u32 %v4056_v3, %v2989_v2  ;;  %v2918_v9 = vor.u32 %v4038_v1, %v2917_v0  ;;  %v2845_v10 = vld [vmem:[#allocation8 + $0x250] sm:$0xf]  ;;  %v4054_v11 = vld [vmem:[#allocation8 + $0x364] sm:$0xf0]  ;;  %v4020_v12 = vld [vmem:[#allocation8 + $0x254] sm:$0xf0] }
  0x28   :  { %215 = vmatpush.bf16.msra.mxu2 %v2774_v34  ;;  %384 = vmatpush.bf16.msra.mxu1 %v2790_v49  ;;  %v2909_v13 = vld [vmem:[#allocation8 + $0x2d0] sm:$0xf]  ;;  %v4036_v14 = vld [vmem:[#allocation8 + $0x2d4] sm:$0xf0]  ;;  %v2982_v15 = vor.u32 %v4054_v11, %v2981_v6  ;;  %v2846_v18 = vor.u32 %v4020_v12, %v2845_v10  ;;  %v2837_v20 = vld [vmem:[#allocation8 + $0x240] sm:$0xf] }
  0x29   :  { %v2973_v16 = vld [vmem:[#allocation8 + $0x350] sm:$0xf]  ;;  %v4052_v17 = vld [vmem:[#allocation8 + $0x354] sm:$0xf0]  ;;  %v2910_v19 = vor.u32 %v4036_v14, %v2909_v13  ;;  %v4018_v21 = vld [vmem:[#allocation8 + $0x244] sm:$0xf0] }
  0x2a   :  { %2779 = vmatmul.msk.bf16.vlgmr.msra.gmra.mxu0 %vm162_vm2, %v4472_v44  ;;  %2780 = vmatmul.msk.bf16.vlgmr.msra.gmra.mxu3 %vm162_vm2, %v4472_v44  ;;  %v2901_v22 = vld [vmem:[#allocation8 + $0x2c0] sm:$0xf]  ;;  %v2974_v23 = vor.u32 %v4052_v17, %v2973_v16  ;;  %v4034_v24 = vld [vmem:[#allocation8 + $0x2c4] sm:$0xf0]  ;;  %v3053_v27 = vld [vmem:[#allocation8 + $0x3f0] sm:$0xf]  ;;  %v2838_v29 = vor.u32 %v4018_v21, %v2837_v20 }
  0x2b   :  { %227 = vmatpush.bf16.msrb.mxu3 %v180_v35  ;;  %370 = vmatpush.bf16.msrb.mxu0 %v353_v39  ;;  %v2965_v25 = vld [vmem:[#allocation8 + $0x340] sm:$0xf]  ;;  %v4050_v26 = vld [vmem:[#allocation8 + $0x344] sm:$0xf0]  ;;  %v4072_v28 = vld [vmem:[#allocation8 + $0x3f4] sm:$0xf0]  ;;  %v2902_v30 = vor.u32 %v4034_v24, %v2901_v22 }
  0x2c   :  { %396 = vmatpush.bf16.msrb.mxu2 %v359_v40  ;;  %2800 = vmatmul.msk.bf16.vlgmr.msra.gmra.mxu1 %vm162_vm2, %v4472_v44  ;;  %v2829_v31 = vld [vmem:[#allocation8 + $0x230] sm:$0xf]  ;;  %v4016_v32 = vld [vmem:[#allocation8 + $0x234] sm:$0xf0]  ;;  %v2966_v34 = vor.u32 %v4050_v26, %v2965_v25  ;;  %v3054_v38 = vor.u32 %v4072_v28, %v3053_v27  ;;  %v3045_v39 = vld [vmem:[#allocation8 + $0x3e0] sm:$0xf] }
  0x2d   :  { %2781 = vmatmul.msk.bf16.vlgmr.msra.gmra.mxu2 %vm162_vm2, %v4472_v44  ;;  %821 = vmatpush.bf16.msrb.mxu1 %v2926_v63  ;;  %v2893_v33 = vld [vmem:[#allocation8 + $0x2b0] sm:$0xf]  ;;  %v4032_v35 = vld [vmem:[#allocation8 + $0x2b4] sm:$0xf0]  ;;  %v4070_v40 = vld [vmem:[#allocation8 + $0x3e4] sm:$0xf0]  ;;  %v2830_v41 = vor.u32 %v4016_v32, %v2829_v31 }
  0x2e   :  { %v2957_v36 = vld [vmem:[#allocation8 + $0x330] sm:$0xf]  ;;  %v4048_v37 = vld [vmem:[#allocation8 + $0x334] sm:$0xf0]  ;;  %v2894_v42 = vor.u32 %v4032_v35, %v2893_v33  ;;  %v2821_v43 = vld [vmem:[#allocation8 + $0x220] sm:$0xf] }
  0x2f   :  { %228 = vmatpush.bf16.msrb.mxu3 %v2778_v50  ;;  %371 = vmatpush.bf16.msrb.mxu0 %v2786_v51  ;;  %v4014_v45 = vld [vmem:[#allocation8 + $0x224] sm:$0xf0]  ;;  %v2885_v46 = vld [vmem:[#allocation8 + $0x2a0] sm:$0xf]  ;;  %v2958_v47 = vor.u32 %v4048_v37, %v2957_v36  ;;  %v3046_v51 = vor.u32 %v4070_v40, %v3045_v39  ;;  %v4068_v53 = vld [vmem:[#allocation8 + $0x3d4] sm:$0xf0] }
  0x30   :  { %397 = vmatpush.bf16.msrb.mxu2 %v2794_v52  ;;  %v4030_v48 = vld [vmem:[#allocation8 + $0x2a4] sm:$0xf0]  ;;  %v2949_v49 = vld [vmem:[#allocation8 + $0x320] sm:$0xf]  ;;  %v3037_v52 = vld [vmem:[#allocation8 + $0x3d0] sm:$0xf]  ;;  %v2822_v54 = vor.u32 %v4014_v45, %v2821_v43 }
  0x31   :  { %822 = vmatpush.bf16.msrb.mxu1 %v2918_v9  ;;  %v4046_v50 = vld [vmem:[#allocation8 + $0x324] sm:$0xf0]  ;;  %v2813_v56 = vld [vmem:[#allocation8 + $0x210] sm:$0xf]  ;;  %v4012_v57 = vld [vmem:[#allocation8 + $0x214] sm:$0xf0]  ;;  %v3038_v63 = vor.u32 %v4068_v53, %v3037_v52 }
  0x32   :  { %v2877_v58 = vld [vmem:[#allocation8 + $0x290] sm:$0xf]  ;;  %v4028_v60 = vld [vmem:[#allocation8 + $0x294] sm:$0xf0]  ;;  %v3029_v0 = vld [vmem:[#allocation8 + $0x3c0] sm:$0xf]  ;;  %v2814_v2 = vor.u32 %v4012_v57, %v2813_v56 }
  0x33   :  { %409 = vmatpush.bf16.msra.mxu3 %v362_v55  ;;  %808 = vmatpush.bf16.msra.mxu0 %v2862_v59  ;;  %v2886_v55 = vor.u32 %v4030_v48, %v2885_v46  ;;  %v2950_v59 = vor.u32 %v4046_v50, %v2949_v49  ;;  %v2941_v61 = vld [vmem:[#allocation8 + $0x310] sm:$0xf]  ;;  %v4044_v62 = vld [vmem:[#allocation8 + $0x314] sm:$0xf0]  ;;  %v4066_v1 = vld [vmem:[#allocation8 + $0x3c4] sm:$0xf0] }
  0x34   :  { %834 = vmatpush.bf16.msra.mxu2 %v2990_v5  ;;  %v2805_v3 = vld [vmem:[#allocation8 + $0x200] sm:$0xf]  ;;  %v4010_v5 = vld [vmem:[#allocation8 + $0x204] sm:$0xf0]  ;;  %v2942_v9 = vor.u32 %v4044_v62, %v2941_v61  ;;  %v4023_v10 = vld [vmem:[#allocation8 + $0x274] sm:$0xf]  ;;  %v3030_v13 = vor.u32 %v4066_v1, %v3029_v0 }
  0x35   :  { %823 = vmatpush.bf16.msrb.mxu1 %v2910_v19  ;;  %v2869_v6 = vld [vmem:[#allocation8 + $0x280] sm:$0xf]  ;;  %v2863_v11 = vld [vmem:[#allocation8 + $0x278] sm:$0xf0]  ;;  %v4039_v12 = vld [vmem:[#allocation8 + $0x2f4] sm:$0xf]  ;;  %v2806_v17 = vor.u32 %v4010_v5, %v2805_v3 }
  0x36   :  { %v2927_v14 = vld [vmem:[#allocation8 + $0x2f8] sm:$0xf0]  ;;  %v4042_v16 = vld [vmem:[#allocation8 + $0x304] sm:$0xf0]  ;;  %v2866_v19 = vor.u32 %v4023_v10, %v2863_v11  ;;  %v4021_v21 = vld [vmem:[#allocation8 + $0x264] sm:$0xf] }
  0x37   :  { %410 = vmatpush.bf16.msra.mxu3 %v2798_v4  ;;  %809 = vmatpush.bf16.msra.mxu0 %v2854_v7  ;;  %v2878_v4 = vor.u32 %v4028_v60, %v2877_v58  ;;  %v4026_v7 = vld [vmem:[#allocation8 + $0x284] sm:$0xf0]  ;;  %v2930_v20 = vor.u32 %v4039_v12, %v2927_v14  ;;  %v2855_v22 = vld [vmem:[#allocation8 + $0x268] sm:$0xf0]  ;;  %v4037_v24 = vld [vmem:[#allocation8 + $0x2e4] sm:$0xf] }
  0x38   :  { %835 = vmatpush.bf16.msra.mxu2 %v2982_v15  ;;  %v2933_v15 = vld [vmem:[#allocation8 + $0x300] sm:$0xf]  ;;  %v2919_v25 = vld [vmem:[#allocation8 + $0x2e8] sm:$0xf0]  ;;  %v2858_v26 = vor.u32 %v4021_v21, %v2855_v22  ;;  %v4055_v28 = vld [vmem:[#allocation8 + $0x374] sm:$0xf] }
  0x39   :  { %824 = vmatpush.bf16.msrb.mxu1 %v2902_v30  ;;  %v2922_v27 = vor.u32 %v4037_v24, %v2919_v25  ;;  %v4019_v31 = vld [vmem:[#allocation8 + $0x254] sm:$0xf]  ;;  %v2847_v32 = vld [vmem:[#allocation8 + $0x258] sm:$0xf0]  ;;  %v3021_v36 = vld [vmem:[#allocation8 + $0x3b0] sm:$0xf] }
  0x3a   :  { %2782 = vmatmul.msk.bf16.vlgmr.msrb.gmra.mxu3 %vm162_vm2, %v4472_v44  ;;  %2799 = vmatmul.msk.bf16.vlgmr.msrb.gmra.mxu0 %vm162_vm2, %v4472_v44  ;;  %v4035_v33 = vld [vmem:[#allocation8 + $0x2d4] sm:$0xf]  ;;  %v2911_v35 = vld [vmem:[#allocation8 + $0x2d8] sm:$0xf0]  ;;  %v4064_v37 = vld [vmem:[#allocation8 + $0x3b4] sm:$0xf0] }
  0x3b   :  { %810 = vmatpush.bf16.msra.mxu0 %v2846_v18  ;;  %847 = vmatpush.bf16.msrb.mxu3 %v3054_v38  ;;  %v2870_v18 = vor.u32 %v4026_v7, %v2869_v6  ;;  %v2914_v38 = vor.u32 %v4035_v33, %v2911_v35  ;;  %v3022_v39 = vor.u32 %v4064_v37, %v3021_v36  ;;  %v4053_v40 = vld [vmem:[#allocation8 + $0x364] sm:$0xf]  ;;  %v2839_v45 = vld [vmem:[#allocation8 + $0x248] sm:$0xf0]  ;;  %v3013_v49 = vld [vmem:[#allocation8 + $0x3a0] sm:$0xf] }
  0x3c   :  { %836 = vmatpush.bf16.msra.mxu2 %v2974_v23  ;;  %v2934_v23 = vor.u32 %v4042_v16, %v2933_v15  ;;  %v4017_v43 = vld [vmem:[#allocation8 + $0x244] sm:$0xf]  ;;  %v2903_v48 = vld [vmem:[#allocation8 + $0x2c8] sm:$0xf0]  ;;  %v4051_v52 = vld [vmem:[#allocation8 + $0x354] sm:$0xf] }
  0x3d   :  { %2801 = vmatmul.msk.bf16.vlgmr.msrb.gmra.mxu2 %vm162_vm2, %v4472_v44  ;;  %825 = vmatpush.bf16.msrb.mxu1 %v2894_v42  ;;  %v4033_v46 = vld [vmem:[#allocation8 + $0x2c4] sm:$0xf]  ;;  %v2975_v53 = vld [vmem:[#allocation8 + $0x358] sm:$0xf0]  ;;  %v4015_v56 = vld [vmem:[#allocation8 + $0x234] sm:$0xf] }
  0x3e   :  { %v2906_v50 = vor.u32 %v4033_v46, %v2903_v48  ;;  %v2831_v57 = vld [vmem:[#allocation8 + $0x238] sm:$0xf0]  ;;  %v4031_v58 = vld [vmem:[#allocation8 + $0x2b4] sm:$0xf]  ;;  %v3005_v61 = vld [vmem:[#allocation8 + $0x390] sm:$0xf] }
  0x3f   :  { %811 = vmatpush.bf16.msra.mxu0 %v2838_v29  ;;  %848 = vmatpush.bf16.msrb.mxu3 %v3046_v51  ;;  %v2991_v29 = vld [vmem:[#allocation8 + $0x378] sm:$0xf0]  ;;  %v4062_v51 = vld [vmem:[#allocation8 + $0x3a4] sm:$0xf0]  ;;  %v4060_v62 = vld [vmem:[#allocation8 + $0x394] sm:$0xf0] }
  0x40   :  { %837 = vmatpush.bf16.msra.mxu2 %v2966_v34  ;;  %v2994_v30 = vor.u32 %v4055_v28, %v2991_v29  ;;  %v2850_v34 = vor.u32 %v4019_v31, %v2847_v32  ;;  %v2895_v60 = vld [vmem:[#allocation8 + $0x2b8] sm:$0xf0]  ;;  %v3006_v0 = vor.u32 %v4060_v62, %v3005_v61  ;;  %v4049_v1 = vld [vmem:[#allocation8 + $0x344] sm:$0xf]  ;;  %v2823_v5 = vld [vmem:[#allocation8 + $0x228] sm:$0xf0] }
  0x41   :  { %826 = vmatpush.bf16.msrb.mxu1 %v2886_v55  ;;  %v2978_v55 = vor.u32 %v4051_v52, %v2975_v53  ;;  %v4029_v6 = vld [vmem:[#allocation8 + $0x2a4] sm:$0xf]  ;;  %v2997_v10 = vld [vmem:[#allocation8 + $0x380] sm:$0xf]  ;;  %v4058_v11 = vld [vmem:[#allocation8 + $0x384] sm:$0xf0] }
  0x42   :  { %v4047_v14 = vld [vmem:[#allocation8 + $0x334] sm:$0xf]  ;;  %v2959_v15 = vld [vmem:[#allocation8 + $0x338] sm:$0xf0]  ;;  %v4069_v28 = vld [vmem:[#allocation8 + $0x3e4] sm:$0xf] }
  0x43   :  { %812 = vmatpush.bf16.msra.mxu0 %v2830_v41  ;;  %849 = vmatpush.bf16.msrb.mxu3 %v3038_v63  ;;  %v2983_v41 = vld [vmem:[#allocation8 + $0x368] sm:$0xf0]  ;;  %v2898_v63 = vor.u32 %v4031_v58, %v2895_v60  ;;  %v4071_v16 = vld [vmem:[#allocation8 + $0x3f4] sm:$0xf]  ;;  %v2815_v21 = vld [vmem:[#allocation8 + $0x218] sm:$0xf0] }
  0x44   :  { %838 = vmatpush.bf16.msra.mxu2 %v2958_v47  ;;  %v2986_v42 = vor.u32 %v4053_v40, %v2983_v41  ;;  %v2842_v47 = vor.u32 %v4017_v43, %v2839_v45  ;;  %v2879_v24 = vld [vmem:[#allocation8 + $0x298] sm:$0xf0]  ;;  %v4009_v32 = vld [vmem:[#allocation8 + $0x204] sm:$0xf]  ;;  %v2807_v33 = vld [vmem:[#allocation8 + $0x208] sm:$0xf0] }
  0x45   :  { %827 = vmatpush.bf16.msrb.mxu1 %v2878_v4  ;;  %v4013_v4 = vld [vmem:[#allocation8 + $0x224] sm:$0xf]  ;;  %v2810_v35 = vor.u32 %v4009_v32, %v2807_v33  ;;  %v2871_v36 = vld [vmem:[#allocation8 + $0x288] sm:$0xf0]  ;;  %v4067_v41 = vld [vmem:[#allocation8 + $0x3d4] sm:$0xf] }
  0x46   :  { %v2826_v7 = vor.u32 %v4013_v4, %v2823_v5  ;;  %v4041_v45 = vld [vmem:[#allocation8 + $0x304] sm:$0xf]  ;;  %v2935_v46 = vld [vmem:[#allocation8 + $0x308] sm:$0xf0]  ;;  %v4063_v52 = vld [vmem:[#allocation8 + $0x3b4] sm:$0xf] }
  0x47   :  { %813 = vmatpush.bf16.msra.mxu0 %v2822_v54  ;;  %850 = vmatpush.bf16.msrb.mxu3 %v3030_v13  ;;  %v3014_v54 = vor.u32 %v4062_v51, %v3013_v49  ;;  %v2998_v13 = vor.u32 %v4058_v11, %v2997_v10  ;;  %v4065_v48 = vld [vmem:[#allocation8 + $0x3c4] sm:$0xf]  ;;  %v3031_v49 = vld [vmem:[#allocation8 + $0x3c8] sm:$0xf0]  ;;  %v4491_v51 = vld [vmem:[#allocation7 + $0x4] sm:$0xf] }
  0x48   :  { %839 = vmatpush.bf16.msra.mxu2 %v2950_v59  ;;  %v2834_v59 = vor.u32 %v4015_v56, %v2831_v57  ;;  %v3023_v53 = vld [vmem:[#allocation8 + $0x3b8] sm:$0xf0]  ;;  %v315_v56 = vperm.slane %v4491_v51, 1  ;;  %v4061_v57 = vld [vmem:[#allocation8 + $0x3a4] sm:$0xf]  ;;  %vm2753_vm6 = vcmask 7168  }
  0x49   :  { %828 = vmatpush.bf16.msrb.mxu1 %v2870_v18  ;;  %v3055_v18 = vld [vmem:[#allocation8 + $0x3f8] sm:$0xf0]  ;;  %v3181_v61 = vld [vmem:[#allocation8 + $0xf0] sm:$0xf]  ;;  %v3972_v62 = vld [vmem:[#allocation8 + $0xf4] sm:$0xf0] }
  0x4a   :  { %2802 = vmatmul.msk.bf16.vlgmr.msra.gmra.mxu3 %vm162_vm2, %v4472_v44  ;;  %v3182_v5 = vor.u32 %v3972_v62, %v3181_v61  ;;  %v3970_v10 = vld [vmem:[#allocation8 + $0xe4] sm:$0xf0]  ;;  %v3109_v32 = vld [vmem:[#allocation8 + $0x60] sm:$0xf] }
  0x4b   :  { %814 = vmatpush.bf16.msra.mxu0 %v2814_v2  ;;  %851 = vmatpush.bf16.msrb.mxu3 %v3022_v39  ;;  %v2967_v2 = vld [vmem:[#allocation8 + $0x348] sm:$0xf0]  ;;  %v2943_v39 = vld [vmem:[#allocation8 + $0x318] sm:$0xf0]  ;;  %v3093_v61 = vld [vmem:[#allocation8 + $0x40] sm:$0xf] }
  0x4c   :  { %840 = vmatpush.bf16.msra.mxu2 %v2942_v9  ;;  %v2970_v3 = vor.u32 %v4049_v1, %v2967_v2  ;;  %v2887_v9 = vld [vmem:[#allocation8 + $0x2a8] sm:$0xf0] }
  0x4d   :  { %873 = vmatpush.bf16.msra.mxu1 %v2930_v20  ;;  %v2890_v12 = vor.u32 %v4029_v6, %v2887_v9  ;;  %v4011_v20 = vld [vmem:[#allocation8 + $0x214] sm:$0xf]  ;;  %v3007_v6 = vld [vmem:[#allocation8 + $0x398] sm:$0xf0]  ;;  %v3173_v9 = vld [vmem:[#allocation8 + $0xe0] sm:$0xf] }
  0x4e   :  { %v2818_v22 = vor.u32 %v4011_v20, %v2815_v21 }
  0x4f   :  { %815 = vmatpush.bf16.msra.mxu0 %v2806_v17  ;;  %852 = vmatpush.bf16.msrb.mxu3 %v3014_v54  ;;  %v2962_v17 = vor.u32 %v4047_v14, %v2959_v15  ;;  %v2999_v14 = vld [vmem:[#allocation8 + $0x388] sm:$0xf0] }
  0x50   :  { %841 = vmatpush.bf16.msra.mxu2 %v2934_v23  ;;  %v4027_v23 = vld [vmem:[#allocation8 + $0x294] sm:$0xf] }
  0x51   :  { %874 = vmatpush.bf16.msra.mxu1 %v2922_v27  ;;  %v2882_v25 = vor.u32 %v4027_v23, %v2879_v24  ;;  %v2951_v27 = vld [vmem:[#allocation8 + $0x328] sm:$0xf0]  ;;  %v3117_v23 = vld [vmem:[#allocation8 + $0x70] sm:$0xf] }
  0x53   :  { %860 = vmatpush.bf16.msrb.mxu0 %v2866_v19  ;;  %853 = vmatpush.bf16.msrb.mxu3 %v3006_v0  ;;  %v3058_v19 = vor.u32 %v4071_v16, %v3055_v18  ;;  %v314_v16 = vperm.slane %v4491_v51, 0  ;;  %v3968_v18 = vld [vmem:[#allocation8 + $0xd4] sm:$0xf0] }
  0x54   :  { %886 = vmatpush.bf16.msrb.mxu2 %v2994_v30  ;;  %v3047_v30 = vld [vmem:[#allocation8 + $0x3e8] sm:$0xf0] }
  0x55   :  { %875 = vmatpush.bf16.msra.mxu1 %v2914_v38  ;;  %v3050_v31 = vor.u32 %v4069_v28, %v3047_v30  ;;  %v4043_v38 = vld [vmem:[#allocation8 + $0x314] sm:$0xf]  ;;  %v3966_v28 = vld [vmem:[#allocation8 + $0xc4] sm:$0xf0]  ;;  %v316_v30 = vperm.slane %v4491_v51, 2 }
  0x56   :  { %v2946_v40 = vor.u32 %v4043_v38, %v2943_v39 }
  0x57   :  { %861 = vmatpush.bf16.msrb.mxu0 %v2858_v26  ;;  %854 = vmatpush.bf16.msrb.mxu3 %v2998_v13  ;;  %v4045_v26 = vld [vmem:[#allocation8 + $0x324] sm:$0xf]  ;;  %v3174_v13 = vor.u32 %v3970_v10, %v3173_v9  ;;  %v3229_v10 = vld [vmem:[#allocation8 + $0x150] sm:$0xf] }
  0x58   :  { %887 = vmatpush.bf16.msrb.mxu2 %v2986_v42  ;;  %v2954_v29 = vor.u32 %v4045_v26, %v2951_v27  ;;  %v3039_v42 = vld [vmem:[#allocation8 + $0x3d8] sm:$0xf0]  ;;  %v3956_v26 = vld [vmem:[#allocation8 + $0x74] sm:$0xf0]  ;;  %v3157_v27 = vld [vmem:[#allocation8 + $0xc0] sm:$0xf] }
  0x59   :  { %876 = vmatpush.bf16.msra.mxu1 %v2906_v50  ;;  %v3042_v43 = vor.u32 %v4067_v41, %v3039_v42  ;;  %v3034_v50 = vor.u32 %v4065_v48, %v3031_v49  ;;  %v3158_v33 = vor.u32 %v3966_v28, %v3157_v27  ;;  %v3952_v48 = vld [vmem:[#allocation8 + $0x54] sm:$0xf0]  ;;  %v3141_v49 = vld [vmem:[#allocation8 + $0xa0] sm:$0xf] }
  0x5b   :  { %862 = vmatpush.bf16.msrb.mxu0 %v2850_v34  ;;  %899 = vmatpush.bf16.msra.mxu3 %v3058_v19  ;;  %v4025_v34 = vld [vmem:[#allocation8 + $0x284] sm:$0xf] }
  0x5c   :  { %888 = vmatpush.bf16.msrb.mxu2 %v2978_v55  ;;  %v2874_v37 = vor.u32 %v4025_v34, %v2871_v36  ;;  %v3026_v55 = vor.u32 %v4063_v52, %v3023_v53  ;;  %v3149_v36 = vld [vmem:[#allocation8 + $0xb0] sm:$0xf] }
  0x5d   :  { %877 = vmatpush.bf16.msra.mxu1 %v2898_v63  ;;  %v4507_v52 = vld [vmem:[#allocation7] sm:$0xf] }
  0x5f   :  { %863 = vmatpush.bf16.msrb.mxu0 %v2842_v47  ;;  %900 = vmatpush.bf16.msra.mxu3 %v3050_v31  ;;  %v2938_v47 = vor.u32 %v4041_v45, %v2935_v46  ;;  %v3118_v31 = vor.u32 %v3956_v26, %v3117_v23  ;;  %v3988_v45 = vld [vmem:[#allocation8 + $0x174] sm:$0xf0]  ;;  %v3101_v46 = vld [vmem:[#allocation8 + $0x50] sm:$0xf]  ;;  %v3982_v23 = vld [vmem:[#allocation8 + $0x144] sm:$0xf0] }
  0x60   :  { %889 = vmatpush.bf16.msrb.mxu2 %v2970_v3  ;;  %v4059_v3 = vld [vmem:[#allocation8 + $0x394] sm:$0xf]  ;;  %v3946_v26 = vld [vmem:[#allocation8 + $0x24] sm:$0xf0] }
  0x61   :  { %878 = vmatpush.bf16.msra.mxu1 %v2890_v12  ;;  %v3010_v11 = vor.u32 %v4059_v3, %v3007_v6  ;;  %v4057_v12 = vld [vmem:[#allocation8 + $0x384] sm:$0xf]  ;;  %v3960_v3 = vld [vmem:[#allocation8 + $0x94] sm:$0xf0] }
  0x62   :  { %v3002_v19 = vor.u32 %v4057_v12, %v2999_v14  ;;  %v3085_v12 = vld [vmem:[#allocation8 + $0x30] sm:$0xf]  ;;  %v3948_v14 = vld [vmem:[#allocation8 + $0x34] sm:$0xf0] }
  0x63   :  { %864 = vmatpush.bf16.msrb.mxu0 %v2834_v59  ;;  %901 = vmatpush.bf16.msra.mxu3 %v3042_v43  ;;  %v3015_v59 = vld [vmem:[#allocation8 + $0x3a8] sm:$0xf0]  ;;  %v3245_v43 = vld [vmem:[#allocation8 + $0x170] sm:$0xf] }
  0x64   :  { %890 = vmatpush.bf16.msrb.mxu2 %v2962_v17  ;;  %v3018_v63 = vor.u32 %v4061_v57, %v3015_v59  ;;  %v3165_v17 = vld [vmem:[#allocation8 + $0xd0] sm:$0xf]  ;;  %v3237_v59 = vld [vmem:[#allocation8 + $0x160] sm:$0xf] }
  0x65   :  { %879 = vmatpush.bf16.msra.mxu1 %v2882_v25  ;;  %v3166_v24 = vor.u32 %v3968_v18, %v3165_v17  ;;  %v3971_v17 = vld [vmem:[#allocation8 + $0xf4] sm:$0xf]  ;;  %v3183_v18 = vld [vmem:[#allocation8 + $0xf8] sm:$0xf0] }
  0x66   :  { %v3186_v27 = vor.u32 %v3971_v17, %v3183_v18 }
  0x67   :  { %865 = vmatpush.bf16.msrb.mxu0 %v2826_v7  ;;  %902 = vmatpush.bf16.msra.mxu3 %v3034_v50  ;;  %v3962_v50 = vld [vmem:[#allocation8 + $0xa4] sm:$0xf0] }
  0x68   :  { %891 = vmatpush.bf16.msrb.mxu2 %v2954_v29  ;;  %v3142_v62 = vor.u32 %v3962_v50, %v3141_v49  ;;  %v3301_v50 = vld [vmem:[#allocation8 + $0x1e0] sm:$0xf] }
  0x69   :  { %880 = vmatpush.bf16.msra.mxu1 %v2874_v37  ;;  %v3964_v37 = vld [vmem:[#allocation8 + $0xb4] sm:$0xf0] }
  0x6b   :  { %866 = vmatpush.bf16.msrb.mxu0 %v2818_v22  ;;  %903 = vmatpush.bf16.msra.mxu3 %v3026_v55  ;;  %v125_v55 = vperm.slane %v4507_v52, 1 }
  0x6c   :  { %892 = vmatpush.bf16.msrb.mxu2 %v2946_v40 }
  0x6f   :  { %867 = vmatpush.bf16.msrb.mxu0 %v2810_v35  ;;  %904 = vmatpush.bf16.msra.mxu3 %v3018_v63  ;;  %v3954_v35 = vld [vmem:[#allocation8 + $0x64] sm:$0xf0] }
  0x70   :  { %893 = vmatpush.bf16.msrb.mxu2 %v2938_v47  ;;  %v3110_v42 = vor.u32 %v3954_v35, %v3109_v32  ;;  %v3150_v47 = vor.u32 %v3964_v37, %v3149_v36  ;;  %v3950_v63 = vld [vmem:[#allocation8 + $0x44] sm:$0xf0]  ;;  %v4004_v35 = vld [vmem:[#allocation8 + $0x1f4] sm:$0xf0]  ;;  %v3213_v37 = vld [vmem:[#allocation8 + $0x130] sm:$0xf] }
  0x71   :  { %v3094_v9 = vor.u32 %v3950_v63, %v3093_v61  ;;  %v3061_v61 = vld [vmem:[#allocation8] sm:$0xf]  ;;  %v3955_v63 = vld [vmem:[#allocation8 + $0x74] sm:$0xf] }
  0x73   :  { %905 = vmatpush.bf16.msra.mxu3 %v3010_v11  ;;  %v3984_v11 = vld [vmem:[#allocation8 + $0x154] sm:$0xf0] }
  0x77   :  { %906 = vmatpush.bf16.msra.mxu3 %v3002_v19 }
  0xa7   :  { %v4493_v54 = vpop.f32.mrf.mxu0 }
  0xa9   :  { %v386_v58 = vpop.f32.mrf.mxu1 }
  0xaa   :  { %v387_v60 = vadd.f32 %v386_v58, %v315_v56  ;;  %v3246_v56 = vor.u32 %v3988_v45, %v3245_v43  ;;  %v3102_v58 = vor.u32 %v3952_v48, %v3101_v46  ;;  %v3944_v43 = vld [vmem:[#allocation8 + $0x14] sm:$0xf0]  ;;  %v3167_v48 = vld [vmem:[#allocation8 + $0xd8] sm:$0xf0] }
  0xac   :  { %v417_v2 = vmax.f32 %v387_v60, 0.0  ;;  %v3986_v60 = vld [vmem:[#allocation8 + $0x164] sm:$0xf0] }
  0xad   :  { %v4496_v0 = vpop.f32.mrf.mxu3  ;;  %v3238_v6 = vor.u32 %v3986_v60, %v3237_v59  ;;  %v3978_v59 = vld [vmem:[#allocation8 + $0x124] sm:$0xf0] }
  0xae   :  { %v421_v7 = vpack.c.bf16 %v417_v2, %v417_v2  ;;  %v3133_v2 = vld [vmem:[#allocation8 + $0x90] sm:$0xf] }
  0xaf   :  { %v193_v4 = vpop.f32.mrf.mxu0 }
  0xb0   :  { %v4498_v1 = vpop.f32.mrf.mxu2  ;;  %829 = vmatmul.bf16.vlgmr.msrb.gmra.mxu1 %v421_v7 }
  0xb1   :  { %1245 = vmatpush.bf16.msrb.mxu1 %v3182_v5  ;;  %v388_v15 = vpop.f32.mrf.mxu1  ;;  %v205_v5 = vadd.f32 %v4496_v0, %v125_v55  ;;  %v317_v0 = vperm.slane %v4491_v51, 3  ;;  %v3309_v51 = vld [vmem:[#allocation8 + $0x1f0] sm:$0xf]  ;;  %v126_v55 = vperm.slane %v4507_v52, 2 }
  0xb2   :  { %v3125_v15 = vld [vmem:[#allocation8 + $0x80] sm:$0xf]  ;;  %v3310_v46 = vor.u32 %v4004_v35, %v3309_v51  ;;  %v3103_v51 = vld [vmem:[#allocation8 + $0x58] sm:$0xf0] }
  0xb3   :  { %v235_v19 = vmax.f32 %v205_v5, 0.0  ;;  %v3965_v5 = vld [vmem:[#allocation8 + $0xc4] sm:$0xf] }
  0xb5   :  { %v206_v20 = vpop.f32.mrf.mxu3  ;;  %1246 = vmatpush.bf16.msrb.mxu1 %v3174_v13  ;;  %v3134_v13 = vor.u32 %v3960_v3, %v3133_v2 }
  0xb6   :  { %v3230_v20 = vor.u32 %v3984_v11, %v3229_v10  ;;  %v3293_v10 = vld [vmem:[#allocation8 + $0x1d0] sm:$0xf]  ;;  %v4000_v11 = vld [vmem:[#allocation8 + $0x1d4] sm:$0xf0] }
  0xb7   :  { %v373_v22 = vpop.f32.mrf.mxu0  ;;  %v3294_v18 = vor.u32 %v4000_v11, %v3293_v10 }
  0xb8   :  { %v219_v21 = vpop.f32.mrf.mxu2  ;;  %v374_v25 = vadd.f32 %v373_v22, %v314_v16  ;;  %v3958_v16 = vld [vmem:[#allocation8 + $0x84] sm:$0xf0]  ;;  %v3221_v22 = vld [vmem:[#allocation8 + $0x140] sm:$0xf] }
  0xb9   :  { %1247 = vmatpush.bf16.msrb.mxu1 %v3166_v24  ;;  %v3086_v21 = vor.u32 %v3948_v14, %v3085_v12  ;;  %v3126_v24 = vor.u32 %v3958_v16, %v3125_v15  ;;  %v3197_v12 = vld [vmem:[#allocation8 + $0x110] sm:$0xf]  ;;  %v3953_v16 = vld [vmem:[#allocation8 + $0x64] sm:$0xf] }
  0xba   :  { %v416_v29 = vmax.f32 %v374_v25, 0.0  ;;  %v3077_v25 = vld [vmem:[#allocation8 + $0x20] sm:$0xf] }
  0xbb   :  { %v3078_v36 = vor.u32 %v3946_v26, %v3077_v25  ;;  %v3974_v25 = vld [vmem:[#allocation8 + $0x104] sm:$0xf0] }
  0xbc   :  { %v4502_v34 = vpack.c.bf16 %v416_v29, %v416_v29  ;;  %v3969_v29 = vld [vmem:[#allocation8 + $0xe4] sm:$0xf] }
  0xbd   :  { %v4504_v38 = vpop.f32.mrf.mxu3  ;;  %1248 = vmatpush.bf16.msrb.mxu1 %v3158_v33  ;;  %v3222_v33 = vor.u32 %v3982_v23, %v3221_v22  ;;  %v3285_v22 = vld [vmem:[#allocation8 + $0x1c0] sm:$0xf]  ;;  %v3998_v23 = vld [vmem:[#allocation8 + $0x1c4] sm:$0xf0] }
  0xbe   :  { %816 = vmatmul.bf16.vlgmr.msra.gmra.mxu0 %v4502_v34 }
  0xbf   :  { %1232 = vmatpush.bf16.msra.mxu0 %v3118_v31  ;;  %v375_v41 = vpop.f32.mrf.mxu0  ;;  %v4515_v31 = vpack.c.bf16 %v235_v19, %v235_v19  ;;  %v3111_v19 = vld [vmem:[#allocation8 + $0x68] sm:$0xf0] }
  0xc0   :  { %v399_v39 = vpop.f32.mrf.mxu2  ;;  %881 = vmatmul.bf16.vlgmr.msra.gmra.mxu1 %v421_v7 }
  0xc1   :  { %v400_v40 = vadd.f32 %v399_v39, %v316_v30  ;;  %1249 = vmatpush.bf16.msrb.mxu1 %v3150_v47  ;;  %v3175_v30 = vld [vmem:[#allocation8 + $0xe8] sm:$0xf0]  ;;  %v3980_v39 = vld [vmem:[#allocation8 + $0x134] sm:$0xf0]  ;;  %v3967_v47 = vld [vmem:[#allocation8 + $0xd4] sm:$0xf] }
  0xc2   :  { %v3178_v45 = vor.u32 %v3969_v29, %v3175_v30  ;;  %v3170_v2 = vor.u32 %v3967_v47, %v3167_v48  ;;  %v3247_v29 = vld [vmem:[#allocation8 + $0x178] sm:$0xf0] }
  0xc3   :  { %v418_v53 = vmax.f32 %v400_v40, 0.0  ;;  %1233 = vmatpush.bf16.msra.mxu0 %v3110_v42  ;;  %v124_v40 = vperm.slane %v4507_v52, 0  ;;  %v3069_v42 = vld [vmem:[#allocation8 + $0x10] sm:$0xf] }
  0xc5   :  { %v4510_v57 = vpack.c.bf16 %v418_v53, %v418_v53  ;;  %v232_v4 = vpop.f32.mrf.mxu3  ;;  %1250 = vmatpush.bf16.msrb.mxu1 %v3142_v62  ;;  %v4002_v53 = vld [vmem:[#allocation8 + $0x1e4] sm:$0xf0]  ;;  %v192_v60 = vadd.f32 %v4493_v54, %v124_v40  ;;  %v3961_v40 = vld [vmem:[#allocation8 + $0xa4] sm:$0xf] }
  0xc6   :  { %v3942_v62 = vld [vmem:[#allocation8 + $0x4] sm:$0xf0]  ;;  %v3302_v3 = vor.u32 %v4002_v53, %v3301_v50  ;;  %v3119_v4 = vld [vmem:[#allocation8 + $0x78] sm:$0xf0]  ;;  %v3095_v50 = vld [vmem:[#allocation8 + $0x48] sm:$0xf0] }
  0xc7   :  { %842 = vmatmul.bf16.vlgmr.msra.gmra.mxu2 %v4510_v57  ;;  %1234 = vmatpush.bf16.msra.mxu0 %v3102_v58  ;;  %v3205_v58 = vld [vmem:[#allocation8 + $0x120] sm:$0xf]  ;;  %v3062_v54 = vor.u32 %v3942_v62, %v3061_v61  ;;  %v234_v14 = vmax.f32 %v192_v60, 0.0  ;;  %v3122_v15 = vor.u32 %v3955_v63, %v3119_v4  ;;  %v127_v53 = vperm.slane %v4507_v52, 3  ;;  %v3959_v60 = vld [vmem:[#allocation8 + $0x94] sm:$0xf] }
  0xc8   :  { %1258 = vmatpush.bf16.msra.mxu2 %v3246_v56  ;;  %v401_v7 = vpop.f32.mrf.mxu2  ;;  %v3070_v56 = vor.u32 %v3944_v43, %v3069_v42  ;;  %v3985_v43 = vld [vmem:[#allocation8 + $0x164] sm:$0xf]  ;;  %v3135_v61 = vld [vmem:[#allocation8 + $0x98] sm:$0xf0]  ;;  %v3947_v4 = vld [vmem:[#allocation8 + $0x34] sm:$0xf] }
  0xc9   :  { %1251 = vmatpush.bf16.msrb.mxu1 %v3134_v13  ;;  %v3976_v13 = vld [vmem:[#allocation8 + $0x114] sm:$0xf0]  ;;  %v4527_v26 = vpack.c.bf16 %v234_v14, %v234_v14  ;;  %v3138_v10 = vor.u32 %v3959_v60, %v3135_v61  ;;  %v3981_v14 = vld [vmem:[#allocation8 + $0x144] sm:$0xf]  ;;  %v3199_v60 = vld [vmem:[#allocation8 + $0x118] sm:$0xf0] }
  0xcb   :  { %1235 = vmatpush.bf16.msra.mxu0 %v3094_v9  ;;  %v3206_v9 = vor.u32 %v3978_v59, %v3205_v58 }
  0xcc   :  { %1259 = vmatpush.bf16.msra.mxu2 %v3238_v6  ;;  %v3159_v6 = vld [vmem:[#allocation8 + $0xc8] sm:$0xf0] }
  0xcd   :  { %v412_v28 = vpop.f32.mrf.mxu3  ;;  %1252 = vmatpush.bf16.msrb.mxu1 %v3126_v24  ;;  %v3162_v17 = vor.u32 %v3965_v5, %v3159_v6  ;;  %v3189_v24 = vld [vmem:[#allocation8 + $0x100] sm:$0xf]  ;;  %v3087_v5 = vld [vmem:[#allocation8 + $0x38] sm:$0xf0]  ;;  %v231_v6 = vadd.f32 %v4504_v38, %v127_v53  ;;  %v3990_v38 = vld [vmem:[#allocation8 + $0x184] sm:$0xf0] }
  0xce   :  { %v413_v32 = vadd.f32 %v412_v28, %v317_v0  ;;  %868 = vmatmul.bf16.vlgmr.msrb.gmra.mxu0 %v4502_v34  ;;  %v3214_v34 = vor.u32 %v3980_v39, %v3213_v37  ;;  %v3151_v0 = vld [vmem:[#allocation8 + $0xb8] sm:$0xf0]  ;;  %v3987_v28 = vld [vmem:[#allocation8 + $0x174] sm:$0xf]  ;;  %v3190_v35 = vor.u32 %v3974_v25, %v3189_v24  ;;  %v3996_v37 = vld [vmem:[#allocation8 + $0x1b4] sm:$0xf0] }
  0xcf   :  { %1236 = vmatpush.bf16.msra.mxu0 %v3086_v21  ;;  %v3198_v21 = vor.u32 %v3976_v13, %v3197_v12  ;;  %v3250_v39 = vor.u32 %v3987_v28, %v3247_v29  ;;  %v3127_v12 = vld [vmem:[#allocation8 + $0x88] sm:$0xf0]  ;;  %v3090_v13 = vor.u32 %v3947_v4, %v3087_v5  ;;  %v4073_v28 = vld [vmem:[#allocation5 + $0x24] sm:$0xf] }
  0xd0   :  { %1260 = vmatpush.bf16.msra.mxu2 %v3230_v20  ;;  %v419_v41 = vmax.f32 %v413_v32, 0.0  ;;  %1253 = vmatmul.bf16.vlgmr.msrb.gmra.mxu1 %v4515_v31  ;;  %v3963_v20 = vld [vmem:[#allocation8 + $0xb4] sm:$0xf]  ;;  %v3286_v32 = vor.u32 %v3998_v23, %v3285_v22  ;;  %v3311_v23 = vld [vmem:[#allocation8 + $0x1f8] sm:$0xf0] }
  0xd1   :  { %1297 = vmatpush.bf16.msra.mxu1 %v3186_v27  ;;  %v3114_v27 = vor.u32 %v3953_v16, %v3111_v19  ;;  %v3253_v19 = vld [vmem:[#allocation8 + $0x180] sm:$0xf]  ;;  %v4003_v22 = vld [vmem:[#allocation8 + $0x1f4] sm:$0xf]  ;;  %v3319_v29 = vld [vmem:[#allocation5 + $0x64] sm:$0xf0] }
  0xd2   :  { %v4519_v49 = vpack.c.bf16 %v419_v41, %v419_v41  ;;  %v3143_v41 = vld [vmem:[#allocation8 + $0xa8] sm:$0xf0]  ;;  %v3973_v5 = vld [vmem:[#allocation8 + $0x104] sm:$0xf] }
  0xd3   :  { %1237 = vmatpush.bf16.msra.mxu0 %v3078_v36  ;;  %v3277_v36 = vld [vmem:[#allocation8 + $0x1b0] sm:$0xf]  ;;  %v3146_v58 = vor.u32 %v3961_v40, %v3143_v41  ;;  %v3287_v4 = vld [vmem:[#allocation8 + $0x1c8] sm:$0xf0] }
  0xd4   :  { %1261 = vmatpush.bf16.msra.mxu2 %v3222_v33  ;;  %855 = vmatmul.bf16.vlgmr.msrb.gmra.mxu3 %v4519_v49  ;;  %v3951_v33 = vld [vmem:[#allocation8 + $0x54] sm:$0xf]  ;;  %v3278_v48 = vor.u32 %v3996_v37, %v3277_v36  ;;  %v4001_v36 = vld [vmem:[#allocation8 + $0x1e4] sm:$0xf]  ;;  %v3303_v37 = vld [vmem:[#allocation8 + $0x1e8] sm:$0xf0] }
  0xd5   :  { %1298 = vmatpush.bf16.msra.mxu1 %v3178_v45  ;;  %1271 = vmatpush.bf16.msrb.mxu3 %v3310_v46  ;;  %v414_v7 = vpop.f32.mrf.mxu3  ;;  %v3106_v42 = vor.u32 %v3951_v33, %v3103_v51  ;;  %v3239_v45 = vld [vmem:[#allocation8 + $0x168] sm:$0xf0]  ;;  %v3314_v51 = vor.u32 %v4003_v22, %v3311_v23 }
  0xd6   :  { %v4530_v46 = vld [vmem:[#allocation5 + $0xa8] sm:$0x77]  ;;  %v3242_v59 = vor.u32 %v3985_v43, %v3239_v45  ;;  %v3941_v45 = vld [vmem:[#allocation8 + $0x4] sm:$0xf] }
  0xd7   :  { %894 = vmatmul.bf16.vlgmr.msrb.gmra.mxu2 %v4510_v57  ;;  %1238 = vmatpush.bf16.msra.mxu0 %v3070_v56  ;;  %v218_v57 = vadd.f32 %v4498_v1, %v126_v55  ;;  %v3154_v1 = vor.u32 %v3963_v20, %v3151_v0  ;;  %v3269_v55 = vld [vmem:[#allocation8 + $0x1a0] sm:$0xf]  ;;  %v3994_v56 = vld [vmem:[#allocation8 + $0x1a4] sm:$0xf0]  ;;  %v1367_v62 = vunpack.c.h.b16 %v4530_v46  ;;  %v3261_v7 = vld [vmem:[#allocation8 + $0x190] sm:$0xf]  ;;  %v1366_v33 = vunpack.c.l.b16 %v4530_v46 }
  0xd8   :  { %1262 = vmatpush.bf16.msra.mxu2 %v3214_v34  ;;  %v3949_v34 = vld [vmem:[#allocation8 + $0x44] sm:$0xf]  ;;  %v3270_v52 = vor.u32 %v3994_v56, %v3269_v55  ;;  %v3207_v43 = vld [vmem:[#allocation8 + $0x128] sm:$0xf0]  ;;  %v3999_v55 = vld [vmem:[#allocation8 + $0x1d4] sm:$0xf] }
  0xd9   :  { %1299 = vmatpush.bf16.msra.mxu1 %v3170_v2  ;;  %1272 = vmatpush.bf16.msrb.mxu3 %v3302_v3  ;;  %v236_v30 = vmax.f32 %v218_v57, 0.0  ;;  %v3098_v63 = vor.u32 %v3949_v34, %v3095_v50  ;;  %v3983_v2 = vld [vmem:[#allocation8 + $0x154] sm:$0xf]  ;;  %v3231_v3 = vld [vmem:[#allocation8 + $0x158] sm:$0xf0]  ;;  %v1374_v46 = vpack.c.b16 %v1366_v33, %v1366_v33  ;;  %v3306_v50 = vor.u32 %v4001_v36, %v3303_v37 }
  0xda   :  { %v3234_v11 = vor.u32 %v3983_v2, %v3231_v3  ;;  %v3079_v57 = vld [vmem:[#allocation8 + $0x28] sm:$0xf0]  ;;  %v1341_v34 = vld [vmem:[#allocation5 + $0xb0] sm:$0x77]  ;;  %v3295_v56 = vld [vmem:[#allocation8 + $0x1d8] sm:$0xf0] }
  0xdb   :  { %1239 = vmatpush.bf16.msra.mxu0 %v3062_v54  ;;  %v4532_v47 = vpack.c.bf16 %v236_v30, %v236_v30  ;;  %v3957_v54 = vld [vmem:[#allocation8 + $0x84] sm:$0xf]  ;;  %v3943_v30 = vld [vmem:[#allocation8 + $0x14] sm:$0xf]  ;;  %v1368_v61 = vunpack.c.l.b16 %v1341_v34  ;;  %v3393_v33 = vld [vmem:[#allocation8 + $0x470] sm:$0xf] }
  0xdc   :  { %1263 = vmatpush.bf16.msra.mxu2 %v3206_v9  ;;  %v3992_v9 = vld [vmem:[#allocation8 + $0x194] sm:$0xf0]  ;;  %v3130_v20 = vor.u32 %v3957_v54, %v3127_v12  ;;  %v4075_v2 = vld [vmem:[#allocation5 + $0x60] sm:$0xf0]  ;;  %v3995_v54 = vld [vmem:[#allocation8 + $0x1b4] sm:$0xf] }
  0xdd   :  { %1300 = vmatpush.bf16.msra.mxu1 %v3162_v17  ;;  %1273 = vmatpush.bf16.msrb.mxu3 %v3294_v18  ;;  %v3262_v16 = vor.u32 %v3992_v9, %v3261_v7  ;;  %v3945_v17 = vld [vmem:[#allocation8 + $0x24] sm:$0xf]  ;;  %v237_v18 = vmax.f32 %v231_v6, 0.0  ;;  %v3191_v6 = vld [vmem:[#allocation8 + $0x108] sm:$0xf0]  ;;  %v1376_v7 = vpack.c.b16 %v1368_v61, %v1368_v61 }
  0xde   :  { %1240 = vmatmul.bf16.vlgmr.msra.gmra.mxu0 %v4527_v26  ;;  %v3082_v25 = vor.u32 %v3945_v17, %v3079_v57  ;;  %v3279_v12 = vld [vmem:[#allocation8 + $0x1b8] sm:$0xf0]  ;;  %v3271_v17 = vld [vmem:[#allocation8 + $0x1a8] sm:$0xf0]  ;;  %v4108_v37 = vld [vmem:[#allocation8 + $0x4f4] sm:$0xf0] }
  0xdf   :  { %1284 = vmatpush.bf16.msrb.mxu0 %v3122_v15  ;;  %v3223_v15 = vld [vmem:[#allocation8 + $0x148] sm:$0xf0]  ;;  %v4541_v40 = vpack.c.bf16 %v237_v18, %v237_v18  ;;  %v3991_v18 = vld [vmem:[#allocation8 + $0x194] sm:$0xf]  ;;  %v3369_v61 = vld [vmem:[#allocation8 + $0x440] sm:$0xf] }
  0xe0   :  { %1264 = vmatpush.bf16.msra.mxu2 %v3198_v21  ;;  %v3226_v0 = vor.u32 %v3981_v14, %v3223_v15  ;;  %v3979_v21 = vld [vmem:[#allocation8 + $0x134] sm:$0xf]  ;;  %v4076_v14 = vld [vmem:[#allocation5 + $0x68] sm:$0xf0]  ;;  %v3282_v15 = vor.u32 %v3995_v54, %v3279_v12  ;;  %v4084_v54 = vld [vmem:[#allocation8 + $0x434] sm:$0xf0] }
  0xe1   :  { %1301 = vmatpush.bf16.msra.mxu1 %v3154_v1  ;;  %1274 = vmatpush.bf16.msrb.mxu3 %v3286_v32  ;;  %v3254_v1 = vor.u32 %v3990_v38, %v3253_v19  ;;  %v3071_v32 = vld [vmem:[#allocation8 + $0x18] sm:$0xf0]  ;;  %v1369_v38 = vunpack.c.h.b16 %v1341_v34  ;;  %v3425_v12 = vld [vmem:[#allocation8 + $0x4b0] sm:$0xf] }
  0xe2   :  { %v3074_v41 = vor.u32 %v3943_v30, %v3071_v32  ;;  %v3263_v19 = vld [vmem:[#allocation8 + $0x198] sm:$0xf0] }
  0xe3   :  { %1285 = vmatpush.bf16.msrb.mxu0 %v3114_v27  ;;  %v3215_v27 = vld [vmem:[#allocation8 + $0x138] sm:$0xf0]  ;;  %v1377_v22 = vpack.c.b16 %v1369_v38, %v1369_v38  ;;  %v4098_v38 = vld [vmem:[#allocation8 + $0x4a4] sm:$0xf0] }
  0xe4   :  { %1265 = vmatpush.bf16.msra.mxu2 %v3190_v35  ;;  %907 = vmatmul.bf16.vlgmr.msra.gmra.mxu3 %v4519_v49  ;;  %v1375_v49 = vpack.c.b16 %v1367_v62, %v1367_v62  ;;  %v3218_v35 = vor.u32 %v3979_v21, %v3215_v27  ;;  %v1383_v62 = vand.u32 %v1374_v46, %v4463_v8  ;;  %v3255_v21 = vld [vmem:[#allocation8 + $0x188] sm:$0xf0] }
  0xe5   :  { %1275 = vmatpush.bf16.msrb.mxu3 %v3278_v48  ;;  %1302 = vmatpush.bf16.msra.mxu1 %v3146_v58  ;;  %v3063_v48 = vld [vmem:[#allocation8 + $0x8] sm:$0xf0] }
  0xe6   :  { %v1386_v24 = vand.u32 %v1375_v49, %v4463_v8  ;;  %v3066_v58 = vor.u32 %v3941_v45, %v3063_v48  ;;  %v1389_v49 = vand.u32 %v1376_v7, %v4463_v8  ;;  %v4106_v48 = vld [vmem:[#allocation8 + $0x4e4] sm:$0xf0] }
  0xe7   :  { %1286 = vmatpush.bf16.msrb.mxu0 %v3106_v42  ;;  %1266 = vmatmul.bf16.vlgmr.msra.gmra.mxu2 %v4532_v47  ;;  %v3977_v42 = vld [vmem:[#allocation8 + $0x124] sm:$0xf] }
  0xe8   :  { %1310 = vmatpush.bf16.msrb.mxu2 %v3250_v39  ;;  %v3322_v39 = vor.u32 %v4073_v28, %v3319_v29  ;;  %v3210_v53 = vor.u32 %v3977_v42, %v3207_v43  ;;  %v4090_v42 = vld [vmem:[#allocation8 + $0x464] sm:$0xf0]  ;;  %v3449_v43 = vld [vmem:[#allocation8 + $0x4e0] sm:$0xf] }
  0xe9   :  { %1276 = vmatpush.bf16.msrb.mxu3 %v3270_v52  ;;  %1303 = vmatpush.bf16.msra.mxu1 %v3138_v10  ;;  %v3997_v52 = vld [vmem:[#allocation8 + $0x1c4] sm:$0xf]  ;;  %v3450_v46 = vor.u32 %v4106_v48, %v3449_v43  ;;  %v3401_v43 = vld [vmem:[#allocation8 + $0x480] sm:$0xf] }
  0xea   :  { %v3290_v10 = vor.u32 %v3997_v52, %v3287_v4  ;;  %v3521_v52 = vld [vmem:[#allocation8 + $0x570] sm:$0xf] }
  0xeb   :  { %1287 = vmatpush.bf16.msrb.mxu0 %v3098_v63  ;;  %v3317_v63 = vld [vmem:[#allocation5 + $0x20] sm:$0xf] }
  0xec   :  { %1311 = vmatpush.bf16.msrb.mxu2 %v3242_v59  ;;  %v3975_v59 = vld [vmem:[#allocation8 + $0x114] sm:$0xf]  ;;  %v3318_v9 = vor.u32 %v4075_v2, %v3317_v63  ;;  %v3433_v2 = vld [vmem:[#allocation8 + $0x4c0] sm:$0xf] }
  0xed   :  { %1277 = vmatpush.bf16.msrb.mxu3 %v3262_v16  ;;  %1304 = vmatpush.bf16.msra.mxu1 %v3130_v20  ;;  %v3202_v3 = vor.u32 %v3975_v59, %v3199_v60  ;;  %v3993_v16 = vld [vmem:[#allocation8 + $0x1a4] sm:$0xf]  ;;  %v3266_v20 = vor.u32 %v3991_v18, %v3263_v19  ;;  %v4104_v60 = vld [vmem:[#allocation8 + $0x4d4] sm:$0xf0]  ;;  %v4082_v18 = vld [vmem:[#allocation8 + $0x424] sm:$0xf0] }
  0xee   :  { %v3417_v19 = vld [vmem:[#allocation8 + $0x4a0] sm:$0xf] }
  0xef   :  { %1288 = vmatpush.bf16.msrb.mxu0 %v3090_v13  ;;  %v3325_v13 = vld [vmem:[#allocation5 + $0x28] sm:$0xf] }
  0xf0   :  { %1312 = vmatpush.bf16.msrb.mxu2 %v3234_v11  ;;  %1305 = vmatmul.bf16.vlgmr.msra.gmra.mxu1 %v4515_v31  ;;  %v3298_v31 = vor.u32 %v3999_v55, %v3295_v56  ;;  %v3194_v11 = vor.u32 %v3973_v5, %v3191_v6  ;;  %v3326_v57 = vor.u32 %v4076_v14, %v3325_v13  ;;  %v3377_v55 = vld [vmem:[#allocation8 + $0x450] sm:$0xf]  ;;  %v4088_v56 = vld [vmem:[#allocation8 + $0x454] sm:$0xf0] }
  0xf1   :  { %1413 = vmatpush.bf16.msrb.mxu1 %v1386_v24  ;;  %1278 = vmatpush.bf16.msrb.mxu3 %v3254_v1  ;;  %v1392_v24 = vand.u32 %v1377_v22, %v4463_v8  ;;  %v3378_v59 = vor.u32 %v4088_v56, %v3377_v55  ;;  %v4124_v6 = vld [vmem:[#allocation8 + $0x574] sm:$0xf0]  ;;  %v3585_v56 = vld [vmem:[#allocation8 + $0x5f0] sm:$0xf] }
  0xf2   :  { %v4100_v14 = vld [vmem:[#allocation8 + $0x4b4] sm:$0xf0] }
  0xf3   :  { %1289 = vmatpush.bf16.msrb.mxu0 %v3082_v25  ;;  %v4074_v25 = vld [vmem:[#allocation5 + $0x2c] sm:$0xf] }
  0xf4   :  { %1313 = vmatpush.bf16.msrb.mxu2 %v3226_v0  ;;  %1279 = vmatmul.bf16.vlgmr.msrb.gmra.mxu3 %v4541_v40  ;;  %v3989_v0 = vld [vmem:[#allocation8 + $0x184] sm:$0xf] }
  0xf5   :  { %1323 = vmatpush.bf16.msra.mxu3 %v3314_v51  ;;  %1414 = vmatpush.bf16.msrb.mxu1 %v3322_v39  ;;  %v3258_v23 = vor.u32 %v3989_v0, %v3255_v21  ;;  %v4092_v51 = vld [vmem:[#allocation8 + $0x474] sm:$0xf0] }
  0xf6   :  { %v3394_v36 = vor.u32 %v4092_v51, %v3393_v33  ;;  %v4120_v0 = vld [vmem:[#allocation8 + $0x554] sm:$0xf0] }
  0xf7   :  { %1290 = vmatpush.bf16.msrb.mxu0 %v3074_v41  ;;  %v4096_v51 = vld [vmem:[#allocation8 + $0x494] sm:$0xf0] }
  0xf8   :  { %1314 = vmatpush.bf16.msrb.mxu2 %v3218_v35  ;;  %v3457_v35 = vld [vmem:[#allocation8 + $0x4f0] sm:$0xf] }
  0xf9   :  { %1324 = vmatpush.bf16.msra.mxu3 %v3306_v50  ;;  %v3458_v39 = vor.u32 %v4108_v37, %v3457_v35  ;;  %v3497_v35 = vld [vmem:[#allocation8 + $0x540] sm:$0xf] }
  0xfb   :  { %1291 = vmatpush.bf16.msrb.mxu0 %v3066_v58  ;;  %1851 = vmatpush.bf16.msra.mxu1 %v3458_v39  ;;  %v3441_v58 = vld [vmem:[#allocation8 + $0x4d0] sm:$0xf] }
  0xfc   :  { %1315 = vmatpush.bf16.msrb.mxu2 %v3210_v53  ;;  %v3442_v63 = vor.u32 %v4104_v60, %v3441_v58  ;;  %v4140_v58 = vld [vmem:[#allocation8 + $0x5f4] sm:$0xf0] }
  0xfd   :  { %1325 = vmatpush.bf16.msra.mxu3 %v3298_v31  ;;  %v3586_v60 = vor.u32 %v4140_v58, %v3585_v56  ;;  %v4099_v56 = vld [vmem:[#allocation8 + $0x4b4] sm:$0xf] }
  0xfe   :  { %1292 = vmatmul.bf16.vlgmr.msrb.gmra.mxu0 %v4527_v26  ;;  %v3274_v26 = vor.u32 %v3993_v16, %v3271_v17  ;;  %v4122_v16 = vld [vmem:[#allocation8 + $0x564] sm:$0xf0]  ;;  %v3426_v17 = vor.u32 %v4100_v14, %v3425_v12  ;;  %v3387_v12 = vld [vmem:[#allocation8 + $0x468] sm:$0xf0] }
  0xff   :  { %1400 = vmatpush.bf16.msra.mxu0 %v1383_v62  ;;  %1852 = vmatpush.bf16.msra.mxu1 %v3450_v46  ;;  %v4086_v62 = vld [vmem:[#allocation8 + $0x444] sm:$0xf0] }
 0x100   :  { %1316 = vmatpush.bf16.msrb.mxu2 %v3202_v3  ;;  %3332 = vmatmul.msk.bf16.vlgmr.msrb.gmra.mxu1 %vm162_vm2, %v4472_v44  ;;  %v4102_v3 = vld [vmem:[#allocation8 + $0x4c4] sm:$0xf0]  ;;  %v3370_v5 = vor.u32 %v4086_v62, %v3369_v61  ;;  %v4091_v61 = vld [vmem:[#allocation8 + $0x474] sm:$0xf]  ;;  %v3395_v62 = vld [vmem:[#allocation8 + $0x478] sm:$0xf0] }
 0x101   :  { %1326 = vmatpush.bf16.msra.mxu3 %v3290_v10  ;;  %v3434_v7 = vor.u32 %v4102_v3, %v3433_v2  ;;  %v4094_v46 = vld [vmem:[#allocation8 + $0x484] sm:$0xf0]  ;;  %v3398_v2 = vor.u32 %v4091_v61, %v3395_v62  ;;  %v3459_v3 = vld [vmem:[#allocation8 + $0x4f8] sm:$0xf0]  ;;  %v4121_v61 = vld [vmem:[#allocation8 + $0x564] sm:$0xf] }
 0x102   :  { %v3515_v62 = vld [vmem:[#allocation8 + $0x568] sm:$0xf0] }
 0x103   :  { %1401 = vmatpush.bf16.msra.mxu0 %v3318_v9  ;;  %1853 = vmatpush.bf16.msra.mxu1 %v3442_v63  ;;  %v3522_v9 = vor.u32 %v4124_v6, %v3521_v52  ;;  %v4114_v6 = vld [vmem:[#allocation8 + $0x524] sm:$0xf0] }
 0x104   :  { %1317 = vmatpush.bf16.msrb.mxu2 %v3194_v11  ;;  %v3361_v11 = vld [vmem:[#allocation8 + $0x430] sm:$0xf] }
 0x105   :  { %1327 = vmatpush.bf16.msra.mxu3 %v3282_v15  ;;  %v3362_v13 = vor.u32 %v4084_v54, %v3361_v11  ;;  %v3513_v15 = vld [vmem:[#allocation8 + $0x560] sm:$0xf]  ;;  %v4138_v11 = vld [vmem:[#allocation8 + $0x5e4] sm:$0xf0]  ;;  %v4089_v54 = vld [vmem:[#allocation8 + $0x464] sm:$0xf] }
 0x106   :  { %v3390_v14 = vor.u32 %v4089_v54, %v3387_v12  ;;  %v3507_v54 = vld [vmem:[#allocation8 + $0x558] sm:$0xf0] }
 0x107   :  { %1318 = vmatmul.bf16.vlgmr.msrb.gmra.mxu2 %v4532_v47  ;;  %v3327_v47 = vld [vmem:[#allocation5 + $0x6c] sm:$0xf0]  ;;  %1838 = vmatpush.bf16.msrb.mxu0 %v3394_v36  ;;  %v4118_v36 = vld [vmem:[#allocation8 + $0x544] sm:$0xf0] }
 0x108   :  { %1426 = vmatpush.bf16.msra.mxu2 %v1389_v49  ;;  %v3330_v27 = vor.u32 %v4074_v25, %v3327_v47  ;;  %1854 = vmatpush.bf16.msra.mxu1 %v3434_v7  ;;  %v3577_v7 = vld [vmem:[#allocation8 + $0x5e0] sm:$0xf] }
 0x109   :  { %1328 = vmatpush.bf16.msra.mxu3 %v3274_v26  ;;  %v3353_v26 = vld [vmem:[#allocation8 + $0x420] sm:$0xf] }
 0x10c   :  { %1427 = vmatpush.bf16.msra.mxu2 %v3326_v57  ;;  %v3514_v57 = vor.u32 %v4122_v16, %v3513_v15  ;;  %1855 = vmatpush.bf16.msra.mxu1 %v3426_v17  ;;  %v3451_v15 = vld [vmem:[#allocation8 + $0x4e8] sm:$0xf0]  ;;  %v3473_v17 = vld [vmem:[#allocation8 + $0x510] sm:$0xf] }
 0x10d   :  { %1329 = vmatpush.bf16.msra.mxu3 %v3266_v20  ;;  %v3505_v20 = vld [vmem:[#allocation8 + $0x550] sm:$0xf] }
 0x10e   :  { %3331 = vmatmul.msk.bf16.vlgmr.msra.gmra.mxu0 %vm162_vm2, %v4472_v44  ;;  %v3506_v22 = vor.u32 %v4120_v0, %v3505_v20 }
 0x110   :  { %1864 = vmatpush.bf16.msrb.mxu2 %v3522_v9 }
 0x111   :  { %1330 = vmatpush.bf16.msra.mxu3 %v3258_v23  ;;  %v3354_v23 = vor.u32 %v4082_v18, %v3353_v26  ;;  %v3569_v26 = vld [vmem:[#allocation8 + $0x5d0] sm:$0xf] }
 0x114   :  { %1331 = vmatmul.bf16.vlgmr.msra.gmra.mxu3 %v4541_v40  ;;  %v3385_v40 = vld [vmem:[#allocation8 + $0x460] sm:$0xf]  ;;  %1865 = vmatpush.bf16.msrb.mxu2 %v3514_v57  ;;  %v4112_v57 = vld [vmem:[#allocation8 + $0x514] sm:$0xf0] }
 0x115   :  { %1439 = vmatpush.bf16.msrb.mxu3 %v1392_v24  ;;  %v3386_v45 = vor.u32 %v4090_v42, %v3385_v40  ;;  %v3418_v24 = vor.u32 %v4098_v38, %v3417_v19  ;;  %v3337_v40 = vld [vmem:[#allocation8 + $0x400] sm:$0xf]  ;;  %v4078_v42 = vld [vmem:[#allocation8 + $0x404] sm:$0xf0]  ;;  %v3474_v18 = vor.u32 %v4112_v57, %v3473_v17  ;;  %v4136_v19 = vld [vmem:[#allocation8 + $0x5d4] sm:$0xf0] }
 0x116   :  { %v3338_v48 = vor.u32 %v4078_v42, %v3337_v40  ;;  %v4087_v38 = vld [vmem:[#allocation8 + $0x454] sm:$0xf]  ;;  %v3570_v0 = vor.u32 %v4136_v19, %v3569_v26  ;;  %v3347_v26 = vld [vmem:[#allocation8 + $0x418] sm:$0xf0] }
 0x117   :  { %3333 = vmatmul.msk.bf16.vlgmr.msra.gmra.mxu2 %vm162_vm2, %v4472_v44  ;;  %1839 = vmatpush.bf16.msrb.mxu0 %v3386_v45  ;;  %v4123_v40 = vld [vmem:[#allocation8 + $0x574] sm:$0xf] }
 0x118   :  { %1866 = vmatpush.bf16.msrb.mxu2 %v3506_v22  ;;  %1856 = vmatpush.bf16.msra.mxu1 %v3418_v24  ;;  %v4103_v22 = vld [vmem:[#allocation8 + $0x4d4] sm:$0xf] }
 0x119   :  { %1440 = vmatpush.bf16.msrb.mxu3 %v3330_v27  ;;  %v4079_v57 = vld [vmem:[#allocation8 + $0x414] sm:$0xf] }
 0x11b   :  { %1840 = vmatpush.bf16.msrb.mxu0 %v3378_v59 }
 0x11d   :  { %1877 = vmatpush.bf16.msra.mxu3 %v3586_v60  ;;  %v3427_v60 = vld [vmem:[#allocation8 + $0x4b8] sm:$0xf0] }
 0x11f   :  { %1841 = vmatpush.bf16.msrb.mxu0 %v3370_v5  ;;  %v3481_v5 = vld [vmem:[#allocation8 + $0x520] sm:$0xf] }
 0x120   :  { %v3482_v9 = vor.u32 %v4114_v6, %v3481_v5  ;;  %v4081_v5 = vld [vmem:[#allocation8 + $0x424] sm:$0xf]  ;;  %v3355_v6 = vld [vmem:[#allocation8 + $0x428] sm:$0xf0] }
 0x123   :  { %1842 = vmatpush.bf16.msrb.mxu0 %v3362_v13 }
 0x124   :  { %3334 = vmatmul.msk.bf16.vlgmr.msrb.gmra.mxu3 %vm162_vm2, %v4472_v44 }
 0x127   :  { %1843 = vmatpush.bf16.msrb.mxu0 %v3354_v23 }
 0x12d   :  { %v830_v28 = vpop.f32.mrf.mxu1 }
 0x135   :  { %v832_v29 = vpop.f32.mrf.mxu1 }
 0x13b   :  { %v817_v1 = vpop.f32.mrf.mxu0 }
 0x13c   :  { %v831_v30 = vadd.f32 %v830_v28, %v817_v1  ;;  %v3345_v1 = vld [vmem:[#allocation8 + $0x410] sm:$0xf] }
 0x13d   :  { %v882_v32 = vpop.f32.mrf.mxu1 }
 0x143   :  { %v819_v41 = vpop.f32.mrf.mxu0 }
 0x144   :  { %v3498_v41 = vor.u32 %v4118_v36, %v3497_v35  ;;  %v4085_v35 = vld [vmem:[#allocation8 + $0x444] sm:$0xf]  ;;  %v3371_v36 = vld [vmem:[#allocation8 + $0x448] sm:$0xf0] }
 0x145   :  { %v884_v34 = vpop.f32.mrf.mxu1 }
 0x146   :  { %v3489_v34 = vld [vmem:[#allocation8 + $0x530] sm:$0xf]  ;;  %1867 = vmatpush.bf16.msrb.mxu2 %v3498_v41  ;;  %v3435_v41 = vld [vmem:[#allocation8 + $0x4c8] sm:$0xf0] }
 0x14a   :  { %v843_v50 = vpop.f32.mrf.mxu2 }
 0x14b   :  { %v844_v53 = vadd.f32 %v843_v50, %v831_v30  ;;  %v869_v31 = vpop.f32.mrf.mxu0  ;;  %v4080_v30 = vld [vmem:[#allocation8 + $0x414] sm:$0xf0] }
 0x14c   :  { %v883_v4 = vadd.f32 %v882_v32, %v869_v31  ;;  %v3409_v32 = vld [vmem:[#allocation8 + $0x490] sm:$0xf]  ;;  %v3346_v33 = vor.u32 %v4080_v30, %v3345_v1  ;;  %v4116_v50 = vld [vmem:[#allocation8 + $0x534] sm:$0xf0]  ;;  %v4107_v31 = vld [vmem:[#allocation8 + $0x4f4] sm:$0xf] }
 0x14d   :  { %v1254_v10 = vpop.f32.mrf.mxu1  ;;  %v3410_v39 = vor.u32 %v4096_v51, %v3409_v32  ;;  %v3490_v55 = vor.u32 %v4116_v50, %v3489_v34  ;;  %v3465_v1 = vld [vmem:[#allocation8 + $0x500] sm:$0xf]  ;;  %v4110_v30 = vld [vmem:[#allocation8 + $0x504] sm:$0xf0] }
 0x14e   :  { %1844 = vmatpush.bf16.msrb.mxu0 %v3346_v33  ;;  %v3561_v32 = vld [vmem:[#allocation8 + $0x5c0] sm:$0xf]  ;;  %v3466_v33 = vor.u32 %v4110_v30, %v3465_v1  ;;  %v4134_v51 = vld [vmem:[#allocation8 + $0x5c4] sm:$0xf0] }
 0x14f   :  { %1857 = vmatpush.bf16.msra.mxu1 %v3410_v39  ;;  %1868 = vmatpush.bf16.msrb.mxu2 %v3490_v55  ;;  %v4101_v39 = vld [vmem:[#allocation8 + $0x4c4] sm:$0xf]  ;;  %v3363_v55 = vld [vmem:[#allocation8 + $0x438] sm:$0xf0]  ;;  %v3529_v30 = vld [vmem:[#allocation8 + $0x580] sm:$0xf] }
 0x150   :  { %v3438_v42 = vor.u32 %v4101_v39, %v3435_v41  ;;  %v4115_v39 = vld [vmem:[#allocation8 + $0x534] sm:$0xf]  ;;  %v3491_v41 = vld [vmem:[#allocation8 + $0x538] sm:$0xf0] }
 0x152   :  { %v845_v49 = vpop.f32.mrf.mxu2  ;;  %1845 = vmatpush.bf16.msrb.mxu0 %v3338_v48  ;;  %v3553_v48 = vld [vmem:[#allocation8 + $0x5b0] sm:$0xf] }
 0x153   :  { %v871_v21 = vpop.f32.mrf.mxu0  ;;  %v4105_v49 = vld [vmem:[#allocation8 + $0x4e4] sm:$0xf]  ;;  %1869 = vmatpush.bf16.msrb.mxu2 %v3482_v9  ;;  %v3358_v9 = vor.u32 %v4081_v5, %v3355_v6 }
 0x154   :  { %v3454_v16 = vor.u32 %v4105_v49, %v3451_v15  ;;  %v3379_v21 = vld [vmem:[#allocation8 + $0x458] sm:$0xf0]  ;;  %v4128_v15 = vld [vmem:[#allocation8 + $0x594] sm:$0xf0] }
 0x155   :  { %v1256_v47 = vpop.f32.mrf.mxu1 }
 0x156   :  { %1890 = vmatpush.bf16.msra.mxu0 %v3398_v2  ;;  %v3443_v47 = vld [vmem:[#allocation8 + $0x4d8] sm:$0xf0]  ;;  %v3518_v2 = vor.u32 %v4121_v61, %v3515_v62 }
 0x157   :  { %v856_v25 = vpop.f32.mrf.mxu3  ;;  %1870 = vmatpush.bf16.msrb.mxu2 %v3474_v18  ;;  %v4095_v18 = vld [vmem:[#allocation8 + $0x494] sm:$0xf] }
 0x158   :  { %v857_v27 = vadd.f32 %v856_v25, %v844_v53  ;;  %v3402_v53 = vor.u32 %v4094_v46, %v3401_v43  ;;  %v3382_v25 = vor.u32 %v4087_v38, %v3379_v21  ;;  %v3523_v43 = vld [vmem:[#allocation8 + $0x578] sm:$0xf0]  ;;  %v4132_v46 = vld [vmem:[#allocation8 + $0x5b4] sm:$0xf0]  ;;  %v3350_v38 = vor.u32 %v4079_v57, %v3347_v26  ;;  %v3499_v21 = vld [vmem:[#allocation8 + $0x548] sm:$0xf0] }
 0x159   :  { %v3554_v50 = vor.u32 %v4132_v46, %v3553_v48  ;;  %v4113_v46 = vld [vmem:[#allocation8 + $0x524] sm:$0xf] }
 0x15a   :  { %v895_v28 = vpop.f32.mrf.mxu2  ;;  %1858 = vmatpush.bf16.msra.mxu1 %v3402_v53  ;;  %1891 = vmatpush.bf16.msra.mxu0 %v3390_v14  ;;  %v4083_v53 = vld [vmem:[#allocation8 + $0x434] sm:$0xf]  ;;  %v3537_v14 = vld [vmem:[#allocation8 + $0x590] sm:$0xf] }
 0x15b   :  { %v4559_v29 = vadd.f32 %v895_v28, %v883_v4  ;;  %v1241_v37 = vpop.f32.mrf.mxu0  ;;  %v3462_v4 = vor.u32 %v4107_v31, %v3459_v3  ;;  %v3446_v28 = vor.u32 %v4103_v22, %v3443_v47  ;;  %1871 = vmatpush.bf16.msrb.mxu2 %v3466_v33  ;;  %v3545_v3 = vld [vmem:[#allocation8 + $0x5a0] sm:$0xf]  ;;  %v3538_v17 = vor.u32 %v4128_v15, %v3537_v14  ;;  %v4133_v14 = vld [vmem:[#allocation8 + $0x5c4] sm:$0xf] }
 0x15c   :  { %v1242_v45 = vadd.f32 %v1241_v37, %v857_v27  ;;  %v3562_v37 = vor.u32 %v4134_v51, %v3561_v32  ;;  %v4126_v32 = vld [vmem:[#allocation8 + $0x584] sm:$0xf0]  ;;  %v4077_v51 = vld [vmem:[#allocation8 + $0x404] sm:$0xf] }
 0x15d   :  { %v3530_v33 = vor.u32 %v4126_v32, %v3529_v30 }
 0x15e   :  { %v1255_v59 = vadd.f32 %v1254_v10, %v1242_v45  ;;  %1903 = vmatpush.bf16.msrb.mxu1 %v3462_v4  ;;  %v3578_v10 = vor.u32 %v4138_v11, %v3577_v7  ;;  %1892 = vmatpush.bf16.msra.mxu0 %v3382_v25  ;;  %v3526_v45 = vor.u32 %v4123_v40, %v3523_v43  ;;  %v4097_v7 = vld [vmem:[#allocation8 + $0x4a4] sm:$0xf]  ;;  %v3419_v11 = vld [vmem:[#allocation8 + $0x4a8] sm:$0xf0]  ;;  %v3587_v43 = vld [vmem:[#allocation8 + $0x5f8] sm:$0xf0] }
 0x15f   :  { %v858_v63 = vpop.f32.mrf.mxu3  ;;  %v3422_v12 = vor.u32 %v4097_v7, %v3419_v11 }
 0x160   :  { %1878 = vmatpush.bf16.msra.mxu3 %v3578_v10  ;;  %1916 = vmatpush.bf16.msra.mxu2 %v3526_v45  ;;  %v3430_v63 = vor.u32 %v4099_v56, %v3427_v60  ;;  %v4119_v10 = vld [vmem:[#allocation8 + $0x554] sm:$0xf]  ;;  %v1948_v60 = vld [vmem:[#allocation5 + $0xb8] sm:$0x77] }
 0x161   :  { %v3510_v49 = vor.u32 %v4119_v10, %v3507_v54  ;;  %v1975_v5 = vunpack.c.h.b16 %v1948_v60  ;;  %v1974_v6 = vunpack.c.l.b16 %v1948_v60 }
 0x162   :  { %v897_v52 = vpop.f32.mrf.mxu2  ;;  %1904 = vmatpush.bf16.msrb.mxu1 %v3454_v16 }
 0x163   :  { %v1243_v13 = vpop.f32.mrf.mxu0  ;;  %v4130_v52 = vld [vmem:[#allocation8 + $0x5a4] sm:$0xf0]  ;;  %v1983_v10 = vpack.c.b16 %v1975_v5, %v1975_v5 }
 0x164   :  { %1879 = vmatpush.bf16.msra.mxu3 %v3570_v0  ;;  %v3546_v4 = vor.u32 %v4130_v52, %v3545_v3  ;;  %1917 = vmatpush.bf16.msra.mxu2 %v3518_v2  ;;  %v4568_v13 = vld [vmem:[#allocation7 + $0x8] sm:$0xf]  ;;  %v4117_v0 = vld [vmem:[#allocation8 + $0x544] sm:$0xf] }
 0x165   :  { %v3502_v47 = vor.u32 %v4117_v0, %v3499_v21  ;;  %v1345_v1 = vperm.slane %v4568_v13, 1  ;;  %v4135_v2 = vld [vmem:[#allocation8 + $0x5d4] sm:$0xf]  ;;  %v1344_v11 = vperm.slane %v4568_v13, 0  ;;  %v1994_v57 = vand.u32 %v1983_v10, %v4463_v8  ;;  %v3555_v0 = vld [vmem:[#allocation8 + $0x5b8] sm:$0xf0] }
 0x166   :  { %1905 = vmatpush.bf16.msrb.mxu1 %v3446_v28  ;;  %v4141_v21 = vld [vmem:[#allocation5 + $0x34] sm:$0xf]  ;;  %v4142_v10 = vld [vmem:[#allocation5 + $0x3c] sm:$0xf] }
 0x167   :  { %v908_v20 = vpop.f32.mrf.mxu3 }
 0x168   :  { %v4562_v23 = vadd.f32 %v908_v20, %v4559_v29  ;;  %v3374_v29 = vor.u32 %v4085_v35, %v3371_v36  ;;  %1880 = vmatpush.bf16.msra.mxu3 %v3562_v37  ;;  %1918 = vmatpush.bf16.msra.mxu2 %v3510_v49  ;;  %v3411_v20 = vld [vmem:[#allocation8 + $0x498] sm:$0xf0]  ;;  %v3339_v35 = vld [vmem:[#allocation8 + $0x408] sm:$0xf0]  ;;  %v4093_v36 = vld [vmem:[#allocation8 + $0x484] sm:$0xf] }
 0x169   :  { %v3414_v25 = vor.u32 %v4095_v18, %v3411_v20  ;;  %v3467_v49 = vld [vmem:[#allocation8 + $0x508] sm:$0xf0]  ;;  %v1982_v18 = vpack.c.b16 %v1974_v6, %v1974_v6  ;;  %v4131_v20 = vld [vmem:[#allocation8 + $0x5b4] sm:$0xf] }
 0x16a   :  { %v1267_v24 = vpop.f32.mrf.mxu2  ;;  %1893 = vmatpush.bf16.msra.mxu0 %v3374_v29  ;;  %1906 = vmatpush.bf16.msrb.mxu1 %v3438_v42  ;;  %v3403_v29 = vld [vmem:[#allocation8 + $0x488] sm:$0xf0]  ;;  %v4139_v42 = vld [vmem:[#allocation8 + $0x5f4] sm:$0xf] }
 0x16b   :  { %v4564_v27 = vadd.f32 %v1267_v24, %v1255_v59  ;;  %v3366_v59 = vor.u32 %v4083_v53, %v3363_v55  ;;  %v3406_v40 = vor.u32 %v4093_v36, %v3403_v29  ;;  %v3590_v45 = vor.u32 %v4139_v42, %v3587_v43  ;;  %v4137_v53 = vld [vmem:[#allocation8 + $0x5e4] sm:$0xf]  ;;  %v3547_v36 = vld [vmem:[#allocation8 + $0x5a8] sm:$0xf0] }
 0x16c   :  { %1881 = vmatpush.bf16.msra.mxu3 %v3554_v50  ;;  %1919 = vmatpush.bf16.msra.mxu2 %v3502_v47  ;;  %v3483_v50 = vld [vmem:[#allocation8 + $0x528] sm:$0xf0]  ;;  %v1991_v47 = vand.u32 %v1982_v18, %v4463_v8  ;;  %v1346_v42 = vperm.slane %v4568_v13, 2 }
 0x16d   :  { %v4566_v34 = vpop.f32.mrf.mxu1 }
 0x16e   :  { %1894 = vmatpush.bf16.msra.mxu0 %v3366_v59  ;;  %1907 = vmatpush.bf16.msrb.mxu1 %v3430_v63  ;;  %v3475_v63 = vld [vmem:[#allocation8 + $0x518] sm:$0xf0] }
 0x16f   :  { %v910_v58 = vpop.f32.mrf.mxu3 }
 0x170   :  { %1882 = vmatpush.bf16.msra.mxu3 %v3546_v4  ;;  %v3579_v58 = vld [vmem:[#allocation8 + $0x5e8] sm:$0xf0]  ;;  %v3571_v4 = vld [vmem:[#allocation8 + $0x5d8] sm:$0xf0] }
 0x171   :  { %v3582_v61 = vor.u32 %v4137_v53, %v3579_v58  ;;  %v3574_v7 = vor.u32 %v4135_v2, %v3571_v4  ;;  %v4125_v53 = vld [vmem:[#allocation8 + $0x584] sm:$0xf] }
 0x172   :  { %v1269_v31 = vpop.f32.mrf.mxu2  ;;  %1895 = vmatpush.bf16.msra.mxu0 %v3358_v9  ;;  %1908 = vmatpush.bf16.msrb.mxu1 %v3422_v12  ;;  %v4109_v12 = vld [vmem:[#allocation8 + $0x504] sm:$0xf] }
 0x173   :  { %v4111_v31 = vld [vmem:[#allocation8 + $0x514] sm:$0xf] }
 0x174   :  { %1883 = vmatpush.bf16.msra.mxu3 %v3538_v17  ;;  %v3478_v52 = vor.u32 %v4111_v31, %v3475_v63  ;;  %v3563_v17 = vld [vmem:[#allocation8 + $0x5c8] sm:$0xf0] }
 0x175   :  { %v1308_v16 = vpop.f32.mrf.mxu1 }
 0x176   :  { %1896 = vmatpush.bf16.msra.mxu0 %v3350_v38  ;;  %1909 = vmatpush.bf16.msrb.mxu1 %v3414_v25  ;;  %v3470_v16 = vor.u32 %v4109_v12, %v3467_v49  ;;  %v3595_v25 = vld [vmem:[#allocation5 + $0x74] sm:$0xf0]  ;;  %v3669_v12 = vld [vmem:[#allocation8 + $0x670] sm:$0xf] }
 0x177   :  { %v1280_v19 = vpop.f32.mrf.mxu3  ;;  %v4160_v49 = vld [vmem:[#allocation8 + $0x674] sm:$0xf0] }
 0x178   :  { %v4571_v22 = vadd.f32 %v1280_v19, %v4564_v27  ;;  %v3342_v27 = vor.u32 %v4077_v51, %v3339_v35  ;;  %1884 = vmatpush.bf16.msra.mxu3 %v3530_v33  ;;  %v3566_v19 = vor.u32 %v4133_v14, %v3563_v17  ;;  %v3593_v33 = vld [vmem:[#allocation5 + $0x30] sm:$0xf]  ;;  %v4143_v51 = vld [vmem:[#allocation5 + $0x70] sm:$0xf0]  ;;  %v4129_v35 = vld [vmem:[#allocation8 + $0x5a4] sm:$0xf] }
 0x179   :  { %v3594_v29 = vor.u32 %v4143_v51, %v3593_v33  ;;  %v3733_v14 = vld [vmem:[#allocation8 + $0x6f0] sm:$0xf]  ;;  %v3661_v17 = vld [vmem:[#allocation8 + $0x660] sm:$0xf]  ;;  %v4170_v51 = vld [vmem:[#allocation8 + $0x6c4] sm:$0xf0] }
 0x17a   :  { %1897 = vmatpush.bf16.msra.mxu0 %v3342_v27  ;;  %1910 = vmatpush.bf16.msrb.mxu1 %v3406_v40  ;;  %v3539_v40 = vld [vmem:[#allocation8 + $0x598] sm:$0xf0]  ;;  %v3709_v33 = vld [vmem:[#allocation8 + $0x6c0] sm:$0xf] }
 0x17b   :  { %v1293_v24 = vpop.f32.mrf.mxu0 }
 0x17c   :  { %v1294_v28 = vadd.f32 %v1293_v24, %v4562_v23  ;;  %v3494_v23 = vor.u32 %v4115_v39, %v3491_v41  ;;  %1929 = vmatpush.bf16.msrb.mxu3 %v3590_v45  ;;  %v3550_v39 = vor.u32 %v4129_v35, %v3547_v36  ;;  %v4127_v41 = vld [vmem:[#allocation8 + $0x594] sm:$0xf]  ;;  %v3710_v36 = vor.u32 %v4170_v51, %v3709_v33  ;;  %v3655_v51 = vld [vmem:[#allocation8 + $0x658] sm:$0xf0] }
 0x17d   :  { %v1416_v48 = vpop.f32.mrf.mxu1  ;;  %v3542_v45 = vor.u32 %v4127_v41, %v3539_v40  ;;  %v4168_v41 = vld [vmem:[#allocation8 + $0x6b4] sm:$0xf0]  ;;  %v3797_v40 = vld [vmem:[#allocation8 + $0x770] sm:$0xf]  ;;  %v4155_v33 = vld [vmem:[#allocation8 + $0x654] sm:$0xf] }
 0x17e   :  { %v1307_v37 = vadd.f32 %v4566_v34, %v1294_v28  ;;  %v1417_v55 = vadd.f32 %v1416_v48, %v1345_v1  ;;  %1920 = vmatpush.bf16.msra.mxu2 %v3494_v23  ;;  %v3486_v34 = vor.u32 %v4113_v46, %v3483_v50  ;;  %v3558_v28 = vor.u32 %v4131_v20, %v3555_v0 }
 0x17f   :  { %v1282_v56 = vpop.f32.mrf.mxu3  ;;  %v3598_v1 = vor.u32 %v4141_v21, %v3595_v25  ;;  %v3653_v21 = vld [vmem:[#allocation8 + $0x650] sm:$0xf] }
 0x180   :  { %v1447_v62 = vmax.f32 %v1417_v55, 0.0  ;;  %1930 = vmatpush.bf16.msrb.mxu3 %v3582_v61  ;;  %v3531_v55 = vld [vmem:[#allocation8 + $0x588] sm:$0xf0]  ;;  %v3601_v61 = vld [vmem:[#allocation5 + $0x38] sm:$0xf] }
 0x181   :  { %v3534_v58 = vor.u32 %v4125_v53, %v3531_v55  ;;  %v3717_v25 = vld [vmem:[#allocation8 + $0x6d0] sm:$0xf]  ;;  %v4166_v53 = vld [vmem:[#allocation8 + $0x6a4] sm:$0xf0] }
 0x182   :  { %v1451_v3 = vpack.c.bf16 %v1447_v62, %v1447_v62  ;;  %1921 = vmatpush.bf16.msra.mxu2 %v3486_v34  ;;  %v4144_v62 = vld [vmem:[#allocation5 + $0x78] sm:$0xf0] }
 0x183   :  { %v1295_v59 = vpop.f32.mrf.mxu0  ;;  %v3602_v63 = vor.u32 %v4144_v62, %v3601_v61  ;;  %v4148_v61 = vld [vmem:[#allocation8 + $0x614] sm:$0xf0]  ;;  %v3685_v62 = vld [vmem:[#allocation8 + $0x690] sm:$0xf] }
 0x184   :  { %1859 = vmatmul.bf16.vlgmr.msra.gmra.mxu1 %v1451_v3  ;;  %1931 = vmatpush.bf16.msrb.mxu3 %v3574_v7 }
 0x185   :  { %v1418_v15 = vpop.f32.mrf.mxu1  ;;  %2021 = vmatpush.bf16.msra.mxu1 %v1994_v57  ;;  %v4158_v57 = vld [vmem:[#allocation8 + $0x664] sm:$0xf0] }
 0x186   :  { %1922 = vmatpush.bf16.msra.mxu2 %v3478_v52  ;;  %v1347_v52 = vperm.slane %v4568_v13, 3  ;;  %v3670_v15 = vor.u32 %v4160_v49, %v3669_v12  ;;  %v3662_v20 = vor.u32 %v4158_v57, %v3661_v17  ;;  %v4159_v12 = vld [vmem:[#allocation8 + $0x674] sm:$0xf]  ;;  %v3671_v49 = vld [vmem:[#allocation8 + $0x678] sm:$0xf0] }
 0x187   :  { %v4186_v17 = vld [vmem:[#allocation8 + $0x744] sm:$0xf0] }
 0x188   :  { %1932 = vmatpush.bf16.msrb.mxu3 %v3566_v19  ;;  %v3725_v19 = vld [vmem:[#allocation8 + $0x6e0] sm:$0xf] }
 0x189   :  { %2022 = vmatpush.bf16.msra.mxu1 %v3598_v1  ;;  %v3645_v1 = vld [vmem:[#allocation8 + $0x640] sm:$0xf] }
 0x18a   :  { %v1319_v9 = vpop.f32.mrf.mxu2  ;;  %1923 = vmatpush.bf16.msra.mxu2 %v3470_v16  ;;  %v4176_v16 = vld [vmem:[#allocation8 + $0x6f4] sm:$0xf0] }
 0x18b   :  { %v1320_v54 = vadd.f32 %v1319_v9, %v1307_v37  ;;  %v1403_v26 = vpop.f32.mrf.mxu0  ;;  %v1949_v37 = vld [vmem:[#allocation5 + $0xc0] sm:$0x77]  ;;  %v3734_v18 = vor.u32 %v4176_v16, %v3733_v14  ;;  %v4175_v14 = vld [vmem:[#allocation8 + $0x6f4] sm:$0xf] }
 0x18c   :  { %v1404_v38 = vadd.f32 %v1403_v26, %v1344_v11  ;;  %1933 = vmatpush.bf16.msrb.mxu3 %v3558_v28  ;;  %v1976_v23 = vunpack.c.l.b16 %v1949_v37  ;;  %v4172_v28 = vld [vmem:[#allocation8 + $0x6d4] sm:$0xf0]  ;;  %v3773_v16 = vld [vmem:[#allocation8 + $0x740] sm:$0xf] }
 0x18e   :  { %v1446_v24 = vmax.f32 %v1404_v38, 0.0  ;;  %v1984_v50 = vpack.c.b16 %v1976_v23, %v1976_v23  ;;  %v4174_v38 = vld [vmem:[#allocation8 + $0x6e4] sm:$0xf0]  ;;  %v4192_v23 = vld [vmem:[#allocation8 + $0x774] sm:$0xf0] }
 0x18f   :  { %v3726_v0 = vor.u32 %v4174_v38, %v3725_v19  ;;  %v3663_v19 = vld [vmem:[#allocation8 + $0x668] sm:$0xf0]  ;;  %v4173_v38 = vld [vmem:[#allocation8 + $0x6e4] sm:$0xf] }
 0x190   :  { %v1450_v30 = vpack.c.bf16 %v1446_v24, %v1446_v24  ;;  %1934 = vmatpush.bf16.msrb.mxu3 %v3550_v39  ;;  %v1997_v59 = vand.u32 %v1984_v50, %v4463_v8  ;;  %v4156_v24 = vld [vmem:[#allocation8 + $0x654] sm:$0xf0]  ;;  %v3693_v50 = vld [vmem:[#allocation8 + $0x6a0] sm:$0xf] }
 0x192   :  { %v1321_v32 = vpop.f32.mrf.mxu2  ;;  %1846 = vmatmul.bf16.vlgmr.msrb.gmra.mxu0 %v1450_v30 }
 0x193   :  { %v1405_v27 = vpop.f32.mrf.mxu0  ;;  %2008 = vmatpush.bf16.msrb.mxu0 %v1991_v47  ;;  %v3654_v47 = vor.u32 %v4156_v24, %v3653_v21  ;;  %v3718_v32 = vor.u32 %v4172_v28, %v3717_v25  ;;  %v3765_v21 = vld [vmem:[#allocation8 + $0x730] sm:$0xf]  ;;  %v4184_v24 = vld [vmem:[#allocation8 + $0x734] sm:$0xf0] }
 0x194   :  { %1911 = vmatmul.bf16.vlgmr.msrb.gmra.mxu1 %v1451_v3  ;;  %1935 = vmatpush.bf16.msrb.mxu3 %v3542_v45  ;;  %v1977_v3 = vunpack.c.h.b16 %v1949_v37  ;;  %v3637_v37 = vld [vmem:[#allocation8 + $0x630] sm:$0xf]  ;;  %v4152_v27 = vld [vmem:[#allocation8 + $0x634] sm:$0xf0]  ;;  %v3629_v45 = vld [vmem:[#allocation8 + $0x620] sm:$0xf] }
 0x195   :  { %2459 = vmatpush.bf16.msrb.mxu1 %v3734_v18  ;;  %v3638_v39 = vor.u32 %v4152_v27, %v3637_v37  ;;  %v4157_v18 = vld [vmem:[#allocation8 + $0x664] sm:$0xf]  ;;  %v3861_v28 = vld [vmem:[#allocation8 + $0x7f0] sm:$0xf]  ;;  %v3719_v37 = vld [vmem:[#allocation8 + $0x6d8] sm:$0xf0] }
 0x196   :  { %v1985_v5 = vpack.c.b16 %v1977_v3, %v1977_v3  ;;  %v3781_v3 = vld [vmem:[#allocation8 + $0x750] sm:$0xf]  ;;  %v3757_v27 = vld [vmem:[#allocation8 + $0x720] sm:$0xf] }
 0x197   :  { %v1332_v43 = vpop.f32.mrf.mxu3  ;;  %2009 = vmatpush.bf16.msrb.mxu0 %v3594_v29  ;;  %v3701_v29 = vld [vmem:[#allocation8 + $0x6b0] sm:$0xf] }
 0x198   :  { %v4580_v48 = vadd.f32 %v1332_v43, %v1320_v54  ;;  %1936 = vmatpush.bf16.msrb.mxu3 %v3534_v58  ;;  %v2000_v9 = vand.u32 %v1985_v5, %v4463_v8  ;;  %v3603_v54 = vld [vmem:[#allocation5 + $0x7c] sm:$0xf0]  ;;  %v3798_v43 = vor.u32 %v4192_v23, %v3797_v40  ;;  %v4190_v58 = vld [vmem:[#allocation8 + $0x764] sm:$0xf0] }
 0x199   :  { %v3606_v13 = vor.u32 %v4142_v10, %v3603_v54  ;;  %2460 = vmatpush.bf16.msrb.mxu1 %v3726_v0  ;;  %v3613_v5 = vld [vmem:[#allocation8 + $0x600] sm:$0xf]  ;;  %v3727_v0 = vld [vmem:[#allocation8 + $0x6e8] sm:$0xf0] }
 0x19a   :  { %v1429_v46 = vpop.f32.mrf.mxu2  ;;  %v3730_v25 = vor.u32 %v4173_v38, %v3727_v0  ;;  %v3853_v23 = vld [vmem:[#allocation8 + $0x7e0] sm:$0xf]  ;;  %v4200_v38 = vld [vmem:[#allocation8 + $0x7b4] sm:$0xf0] }
 0x19b   :  { %v1430_v56 = vadd.f32 %v1429_v46, %v1346_v42  ;;  %v3702_v42 = vor.u32 %v4168_v41, %v3701_v29  ;;  %v4150_v46 = vld [vmem:[#allocation8 + $0x624] sm:$0xf0] }
 0x19c   :  { %v3630_v55 = vor.u32 %v4150_v46, %v3629_v45  ;;  %v4182_v29 = vld [vmem:[#allocation8 + $0x724] sm:$0xf0]  ;;  %v4153_v46 = vld [vmem:[#allocation8 + $0x644] sm:$0xf] }
 0x19d   :  { %v1448_v34 = vmax.f32 %v1430_v56, 0.0  ;;  %2461 = vmatpush.bf16.msrb.mxu1 %v3718_v32  ;;  %v3694_v56 = vor.u32 %v4166_v53, %v3693_v50  ;;  %v3758_v40 = vor.u32 %v4182_v29, %v3757_v27  ;;  %v3647_v50 = vld [vmem:[#allocation8 + $0x648] sm:$0xf0]  ;;  %v4169_v53 = vld [vmem:[#allocation8 + $0x6c4] sm:$0xf] }
 0x19f   :  { %v1452_v60 = vpack.c.bf16 %v1448_v34, %v1448_v34  ;;  %v1334_v31 = vpop.f32.mrf.mxu3  ;;  %v3789_v34 = vld [vmem:[#allocation8 + $0x760] sm:$0xf] }
 0x1a1   :  { %1872 = vmatmul.bf16.vlgmr.msrb.gmra.mxu2 %v1452_v60  ;;  %2462 = vmatpush.bf16.msrb.mxu1 %v3710_v36  ;;  %v3658_v36 = vor.u32 %v4155_v33, %v3655_v51 }
 0x1a2   :  { %2034 = vmatpush.bf16.msrb.mxu2 %v1997_v59  ;;  %v1431_v2 = vpop.f32.mrf.mxu2  ;;  %1898 = vmatmul.bf16.vlgmr.msra.gmra.mxu0 %v1450_v30  ;;  %v4154_v30 = vld [vmem:[#allocation8 + $0x644] sm:$0xf0]  ;;  %v3790_v59 = vor.u32 %v4190_v58, %v3789_v34  ;;  %v3749_v34 = vld [vmem:[#allocation8 + $0x710] sm:$0xf]  ;;  %v4180_v58 = vld [vmem:[#allocation8 + $0x714] sm:$0xf0] }
 0x1a3   :  { %2446 = vmatpush.bf16.msra.mxu0 %v3670_v15  ;;  %v3646_v35 = vor.u32 %v4154_v30, %v3645_v1  ;;  %v3735_v15 = vld [vmem:[#allocation8 + $0x6f8] sm:$0xf0]  ;;  %v4208_v1 = vld [vmem:[#allocation8 + $0x7f4] sm:$0xf0] }
 0x1a4   :  { %3608 = vmatmul.msk.bf16.vlgmr.msra.gmra.mxu1 %vm162_vm2, %v4472_v44  ;;  %v3738_v57 = vor.u32 %v4175_v14, %v3735_v15  ;;  %v3862_v30 = vor.u32 %v4208_v1, %v3861_v28  ;;  %v3623_v28 = vld [vmem:[#allocation8 + $0x618] sm:$0xf0]  ;;  %v4163_v1 = vld [vmem:[#allocation8 + $0x694] sm:$0xf] }
 0x1a5   :  { %2463 = vmatpush.bf16.msrb.mxu1 %v3702_v42  ;;  %v4206_v42 = vld [vmem:[#allocation8 + $0x7e4] sm:$0xf0] }
 0x1a6   :  { %2035 = vmatpush.bf16.msrb.mxu2 %v3602_v63  ;;  %v4164_v63 = vld [vmem:[#allocation8 + $0x694] sm:$0xf0]  ;;  %v3854_v45 = vor.u32 %v4206_v42, %v3853_v23 }
 0x1a7   :  { %v1442_v4 = vpop.f32.mrf.mxu3  ;;  %2447 = vmatpush.bf16.msra.mxu0 %v3662_v20  ;;  %v3686_v2 = vor.u32 %v4164_v63, %v3685_v62  ;;  %v3666_v20 = vor.u32 %v4157_v18, %v3663_v19  ;;  %v4204_v62 = vld [vmem:[#allocation8 + $0x7d4] sm:$0xf0]  ;;  %v3695_v18 = vld [vmem:[#allocation8 + $0x6a8] sm:$0xf0]  ;;  %v3829_v19 = vld [vmem:[#allocation8 + $0x7b0] sm:$0xf] }
 0x1a8   :  { %v1443_v6 = vadd.f32 %v1442_v4, %v1347_v52  ;;  %v4188_v52 = vld [vmem:[#allocation8 + $0x754] sm:$0xf0]  ;;  %v3830_v0 = vor.u32 %v4200_v38, %v3829_v19 }
 0x1a9   :  { %2464 = vmatpush.bf16.msrb.mxu1 %v3694_v56  ;;  %v3782_v4 = vor.u32 %v4188_v52, %v3781_v3  ;;  %v3711_v56 = vld [vmem:[#allocation8 + $0x6c8] sm:$0xf0]  ;;  %v3639_v3 = vld [vmem:[#allocation8 + $0x638] sm:$0xf0]  ;;  %v4167_v52 = vld [vmem:[#allocation8 + $0x6b4] sm:$0xf] }
 0x1aa   :  { %v1449_v7 = vmax.f32 %v1443_v6, 0.0  ;;  %v4146_v6 = vld [vmem:[#allocation8 + $0x604] sm:$0xf0] }
 0x1ab   :  { %2448 = vmatpush.bf16.msra.mxu0 %v3654_v47  ;;  %v3766_v47 = vor.u32 %v4184_v24, %v3765_v21  ;;  %v4189_v21 = vld [vmem:[#allocation8 + $0x764] sm:$0xf]  ;;  %v3791_v24 = vld [vmem:[#allocation8 + $0x768] sm:$0xf0] }
 0x1ac   :  { %v1453_v11 = vpack.c.bf16 %v1449_v7, %v1449_v7  ;;  %v3677_v7 = vld [vmem:[#allocation8 + $0x680] sm:$0xf] }
 0x1ad   :  { %2465 = vmatpush.bf16.msrb.mxu1 %v3686_v2  ;;  %v4151_v2 = vld [vmem:[#allocation8 + $0x634] sm:$0xf] }
 0x1ae   :  { %1885 = vmatmul.bf16.vlgmr.msra.gmra.mxu3 %v1453_v11 }
 0x1af   :  { %2047 = vmatpush.bf16.msra.mxu3 %v2000_v9  ;;  %v1444_v26 = vpop.f32.mrf.mxu3  ;;  %2449 = vmatpush.bf16.msra.mxu0 %v3646_v35  ;;  %v3614_v9 = vor.u32 %v4146_v6, %v3613_v5  ;;  %v4171_v35 = vld [vmem:[#allocation8 + $0x6d4] sm:$0xf]  ;;  %v3703_v5 = vld [vmem:[#allocation8 + $0x6b8] sm:$0xf0]  ;;  %v3741_v6 = vld [vmem:[#allocation8 + $0x700] sm:$0xf] }
 0x1b0   :  { %v3774_v26 = vor.u32 %v4186_v17, %v3773_v16  ;;  %v3722_v41 = vor.u32 %v4171_v35, %v3719_v37  ;;  %v4149_v16 = vld [vmem:[#allocation8 + $0x624] sm:$0xf]  ;;  %v3631_v17 = vld [vmem:[#allocation8 + $0x628] sm:$0xf0]  ;;  %v3821_v35 = vld [vmem:[#allocation8 + $0x7a0] sm:$0xf] }
 0x1b1   :  { %1924 = vmatmul.bf16.vlgmr.msra.gmra.mxu2 %v1452_v60  ;;  %v3621_v60 = vld [vmem:[#allocation8 + $0x610] sm:$0xf]  ;;  %v4595_v37 = vld [vmem:[#allocation7 + $0xc] sm:$0xf] }
 0x1b2   :  { %3607 = vmatmul.msk.bf16.vlgmr.msrb.gmra.mxu0 %vm162_vm2, %v4472_v44  ;;  %2472 = vmatpush.bf16.msra.mxu2 %v3798_v43  ;;  %v3622_v31 = vor.u32 %v4148_v61, %v3621_v60  ;;  %v3750_v60 = vor.u32 %v4180_v58, %v3749_v34  ;;  %v3845_v61 = vld [vmem:[#allocation8 + $0x7d0] sm:$0xf]  ;;  %v1953_v42 = vperm.slane %v4595_v37, 1  ;;  %v1952_v38 = vperm.slane %v4595_v37, 0 }
 0x1b3   :  { %2048 = vmatpush.bf16.msra.mxu3 %v3606_v13  ;;  %2450 = vmatpush.bf16.msra.mxu0 %v3638_v39  ;;  %v3674_v13 = vor.u32 %v4159_v12, %v3671_v49  ;;  %v4202_v12 = vld [vmem:[#allocation8 + $0x7c4] sm:$0xf0]  ;;  %v4191_v49 = vld [vmem:[#allocation8 + $0x774] sm:$0xf]  ;;  %v3813_v34 = vld [vmem:[#allocation8 + $0x790] sm:$0xf] }
 0x1b6   :  { %2473 = vmatpush.bf16.msra.mxu2 %v3790_v59  ;;  %v3714_v59 = vor.u32 %v4169_v53, %v3711_v56  ;;  %v3679_v56 = vld [vmem:[#allocation8 + $0x688] sm:$0xf0] }
 0x1b7   :  { %2451 = vmatpush.bf16.msra.mxu0 %v3630_v55  ;;  %v3650_v55 = vor.u32 %v4153_v46, %v3647_v50  ;;  %v3615_v46 = vld [vmem:[#allocation8 + $0x608] sm:$0xf0] }
 0x1ba   :  { %2474 = vmatpush.bf16.msra.mxu2 %v3782_v4  ;;  %v3642_v4 = vor.u32 %v4151_v2, %v3639_v3 }
 0x1bb   :  { %2452 = vmatpush.bf16.msra.mxu0 %v3622_v31  ;;  %v3846_v31 = vor.u32 %v4204_v62, %v3845_v61  ;;  %v4185_v61 = vld [vmem:[#allocation8 + $0x744] sm:$0xf]  ;;  %v3775_v62 = vld [vmem:[#allocation8 + $0x748] sm:$0xf0] }
 0x1be   :  { %1937 = vmatmul.bf16.vlgmr.msrb.gmra.mxu3 %v1453_v11  ;;  %v4162_v11 = vld [vmem:[#allocation8 + $0x684] sm:$0xf0]  ;;  %2475 = vmatpush.bf16.msra.mxu2 %v3774_v26  ;;  %v3634_v26 = vor.u32 %v4149_v16, %v3631_v17 }
 0x1bf   :  { %v3678_v54 = vor.u32 %v4162_v11, %v3677_v7  ;;  %2453 = vmatpush.bf16.msra.mxu0 %v3614_v9  ;;  %2485 = vmatpush.bf16.msrb.mxu3 %v3862_v30  ;;  %v4178_v7 = vld [vmem:[#allocation8 + $0x704] sm:$0xf0]  ;;  %v3706_v11 = vor.u32 %v4167_v52, %v3703_v5  ;;  %v3687_v30 = vld [vmem:[#allocation8 + $0x698] sm:$0xf0]  ;;  %v3805_v52 = vld [vmem:[#allocation8 + $0x780] sm:$0xf] }
 0x1c0   :  { %v3690_v51 = vor.u32 %v4163_v1, %v3687_v30  ;;  %v3847_v30 = vld [vmem:[#allocation8 + $0x7d8] sm:$0xf0] }
 0x1c1   :  { %3609 = vmatmul.msk.bf16.vlgmr.msrb.gmra.mxu2 %vm162_vm2, %v4472_v44  ;;  %2466 = vmatpush.bf16.msrb.mxu1 %v3678_v54  ;;  %v3837_v54 = vld [vmem:[#allocation8 + $0x7c0] sm:$0xf] }
 0x1c2   :  { %2476 = vmatpush.bf16.msra.mxu2 %v3766_v47  ;;  %v3838_v14 = vor.u32 %v4202_v12, %v3837_v54  ;;  %v3794_v47 = vor.u32 %v4189_v21, %v3791_v24  ;;  %v4207_v54 = vld [vmem:[#allocation8 + $0x7f4] sm:$0xf]  ;;  %v3863_v12 = vld [vmem:[#allocation8 + $0x7f8] sm:$0xf0] }
 0x1c3   :  { %2498 = vmatpush.bf16.msrb.mxu0 %v3674_v13  ;;  %2486 = vmatpush.bf16.msrb.mxu3 %v3854_v45  ;;  %v3799_v13 = vld [vmem:[#allocation8 + $0x778] sm:$0xf0]  ;;  %v4145_v45 = vld [vmem:[#allocation8 + $0x604] sm:$0xf]  ;;  %v4179_v24 = vld [vmem:[#allocation8 + $0x714] sm:$0xf] }
 0x1c4   :  { %v3802_v15 = vor.u32 %v4191_v49, %v3799_v13  ;;  %v3618_v53 = vor.u32 %v4145_v45, %v3615_v46  ;;  %v3866_v49 = vor.u32 %v4207_v54, %v3863_v12  ;;  %v3759_v13 = vld [vmem:[#allocation8 + $0x728] sm:$0xf0]  ;;  %v3869_v46 = vld [vmem:[#allocation5 + $0x40] sm:$0xf] }
 0x1c5   :  { %2511 = vmatpush.bf16.msra.mxu1 %v3738_v57  ;;  %v4165_v57 = vld [vmem:[#allocation8 + $0x6a4] sm:$0xf] }
 0x1c6   :  { %2477 = vmatpush.bf16.msra.mxu2 %v3758_v40 }
 0x1c7   :  { %2499 = vmatpush.bf16.msrb.mxu0 %v3666_v20  ;;  %2487 = vmatpush.bf16.msrb.mxu3 %v3846_v31  ;;  %v3698_v20 = vor.u32 %v4165_v57, %v3695_v18  ;;  %v3855_v57 = vld [vmem:[#allocation8 + $0x7e8] sm:$0xf0] }
 0x1c9   :  { %2512 = vmatpush.bf16.msra.mxu1 %v3730_v25  ;;  %v4147_v25 = vld [vmem:[#allocation8 + $0x614] sm:$0xf] }
 0x1ca   :  { %2478 = vmatpush.bf16.msra.mxu2 %v3750_v60  ;;  %v3626_v33 = vor.u32 %v4147_v25, %v3623_v28  ;;  %v4196_v60 = vld [vmem:[#allocation8 + $0x794] sm:$0xf0]  ;;  %v3751_v25 = vld [vmem:[#allocation8 + $0x718] sm:$0xf0] }
 0x1cb   :  { %2500 = vmatpush.bf16.msrb.mxu0 %v3658_v36  ;;  %2488 = vmatpush.bf16.msrb.mxu3 %v3838_v14  ;;  %v4198_v36 = vld [vmem:[#allocation8 + $0x7a4] sm:$0xf0]  ;;  %v3814_v31 = vor.u32 %v4196_v60, %v3813_v34  ;;  %v4181_v14 = vld [vmem:[#allocation8 + $0x724] sm:$0xf]  ;;  %v3754_v1 = vor.u32 %v4179_v24, %v3751_v25 }
 0x1cc   :  { %v3822_v27 = vor.u32 %v4198_v36, %v3821_v35  ;;  %v3762_v18 = vor.u32 %v4181_v14, %v3759_v13  ;;  %v1955_v13 = vperm.slane %v4595_v37, 3  ;;  %v4223_v24 = vld [vmem:[#allocation8 + $0x864] sm:$0xf0] }
 0x1cd   :  { %2513 = vmatpush.bf16.msra.mxu1 %v3722_v41  ;;  %v3783_v41 = vld [vmem:[#allocation8 + $0x758] sm:$0xf0] }
 0x1ce   :  { %3610 = vmatmul.msk.bf16.vlgmr.msra.gmra.mxu3 %vm162_vm2, %v4472_v44 }
 0x1cf   :  { %2501 = vmatpush.bf16.msrb.mxu0 %v3650_v55  ;;  %2489 = vmatpush.bf16.msrb.mxu3 %v3830_v0  ;;  %v4161_v55 = vld [vmem:[#allocation8 + $0x684] sm:$0xf] }
 0x1d1   :  { %2514 = vmatpush.bf16.msra.mxu1 %v3714_v59  ;;  %v3682_v59 = vor.u32 %v4161_v55, %v3679_v56  ;;  %v3839_v55 = vld [vmem:[#allocation8 + $0x7c8] sm:$0xf0] }
 0x1d3   :  { %2502 = vmatpush.bf16.msrb.mxu0 %v3642_v4  ;;  %2490 = vmatpush.bf16.msrb.mxu3 %v3822_v27  ;;  %v4194_v4 = vld [vmem:[#allocation8 + $0x784] sm:$0xf0] }
 0x1d5   :  { %2515 = vmatpush.bf16.msra.mxu1 %v3706_v11 }
 0x1d7   :  { %2503 = vmatpush.bf16.msrb.mxu0 %v3634_v26  ;;  %2491 = vmatpush.bf16.msrb.mxu3 %v3814_v31 }
 0x1d9   :  { %2516 = vmatpush.bf16.msra.mxu1 %v3698_v20 }
 0x1db   :  { %2504 = vmatpush.bf16.msrb.mxu0 %v3626_v33 }
 0x1dd   :  { %2517 = vmatpush.bf16.msra.mxu1 %v3690_v51 }
 0x1df   :  { %2505 = vmatpush.bf16.msrb.mxu0 %v3618_v53 }
 0x1e1   :  { %2518 = vmatpush.bf16.msra.mxu1 %v3682_v59 }
 0x201   :  { %v1860_v10 = vpop.f32.mrf.mxu1 }
 0x209   :  { %v1862_v32 = vpop.f32.mrf.mxu1 }
 0x20f   :  { %v1847_v39 = vpop.f32.mrf.mxu0 }
 0x210   :  { %v4593_v43 = vadd.f32 %v1860_v10, %v1847_v39  ;;  %v3742_v10 = vor.u32 %v4178_v7, %v3741_v6  ;;  %v4187_v39 = vld [vmem:[#allocation8 + $0x754] sm:$0xf]  ;;  %v2554_v6 = vld [vmem:[#allocation5 + $0xc8] sm:$0x7]  ;;  %v3806_v7 = vor.u32 %v4194_v4, %v3805_v52 }
 0x211   :  { %v1912_v63 = vpop.f32.mrf.mxu1  ;;  %v3786_v23 = vor.u32 %v4187_v39, %v3783_v41  ;;  %v2564_v26 = vunpack.c.l.b16 %v2554_v6  ;;  %v4177_v39 = vld [vmem:[#allocation8 + $0x704] sm:$0xf]  ;;  %v3743_v41 = vld [vmem:[#allocation8 + $0x708] sm:$0xf0] }
 0x212   :  { %2479 = vmatpush.bf16.msra.mxu2 %v3742_v10  ;;  %2492 = vmatpush.bf16.msrb.mxu3 %v3806_v7  ;;  %v3746_v53 = vor.u32 %v4177_v39, %v3743_v41  ;;  %v3807_v6 = vld [vmem:[#allocation8 + $0x788] sm:$0xf0] }
 0x213   :  { %v2566_v21 = vpack.c.b16 %v2564_v26, %v2564_v26  ;;  %v3930_v26 = vld [vmem:[#allocation8 + $0x870] sm:$0xf]  ;;  %v3908_v39 = vld [vmem:[#allocation8 + $0x848] sm:$0xf0] }
 0x216   :  { %2524 = vmatpush.bf16.msrb.mxu2 %v3802_v15  ;;  %v4205_v15 = vld [vmem:[#allocation8 + $0x7e4] sm:$0xf]  ;;  %2537 = vmatpush.bf16.msra.mxu3 %v3866_v49 }
 0x217   :  { %v1849_v9 = vpop.f32.mrf.mxu0  ;;  %v3858_v19 = vor.u32 %v4205_v15, %v3855_v57 }
 0x218   :  { %v4183_v9 = vld [vmem:[#allocation8 + $0x734] sm:$0xf] }
 0x219   :  { %v1914_v32 = vpop.f32.mrf.mxu1 }
 0x21a   :  { %2525 = vmatpush.bf16.msrb.mxu2 %v3794_v47  ;;  %2538 = vmatpush.bf16.msra.mxu3 %v3858_v19  ;;  %v4203_v47 = vld [vmem:[#allocation8 + $0x7d4] sm:$0xf] }
 0x21b   :  { %v3850_v33 = vor.u32 %v4203_v47, %v3847_v30  ;;  %v4224_v19 = vld [vmem:[#allocation8 + $0x874] sm:$0xf]  ;;  %v3924_v47 = vld [vmem:[#allocation8 + $0x868] sm:$0xf0] }
 0x21c   :  { %v4220_v30 = vld [vmem:[#allocation8 + $0x854] sm:$0xf] }
 0x21e   :  { %2526 = vmatpush.bf16.msrb.mxu2 %v3786_v23  ;;  %2539 = vmatpush.bf16.msra.mxu3 %v3850_v33  ;;  %v4201_v23 = vld [vmem:[#allocation8 + $0x7c4] sm:$0xf]  ;;  %v3916_v33 = vld [vmem:[#allocation8 + $0x858] sm:$0xf0] }
 0x21f   :  { %v1899_v29 = vpop.f32.mrf.mxu0  ;;  %v3842_v56 = vor.u32 %v4201_v23, %v3839_v55  ;;  %v3900_v55 = vld [vmem:[#allocation8 + $0x838] sm:$0xf0] }
 0x220   :  { %v4597_v40 = vadd.f32 %v1912_v63, %v1899_v29  ;;  %v3778_v63 = vor.u32 %v4185_v61, %v3775_v62  ;;  %v2569_v29 = vand.u32 %v2566_v21, %v4463_v8  ;;  %v4199_v8 = vld [vmem:[#allocation8 + $0x7b4] sm:$0xf]  ;;  %v4197_v61 = vld [vmem:[#allocation8 + $0x7a4] sm:$0xf]  ;;  %v3823_v62 = vld [vmem:[#allocation8 + $0x7a8] sm:$0xf0] }
 0x221   :  { %v2024_v2 = vpop.f32.mrf.mxu1  ;;  %v3922_v21 = vld [vmem:[#allocation8 + $0x860] sm:$0xf] }
 0x222   :  { %v2025_v3 = vadd.f32 %v2024_v2, %v1953_v42  ;;  %2527 = vmatpush.bf16.msrb.mxu2 %v3778_v63  ;;  %2540 = vmatpush.bf16.msra.mxu3 %v3842_v56  ;;  %v4195_v63 = vld [vmem:[#allocation8 + $0x794] sm:$0xf]  ;;  %v3815_v2 = vld [vmem:[#allocation8 + $0x798] sm:$0xf0]  ;;  %v3923_v25 = vor.u32 %v4223_v24, %v3922_v21 }
 0x223   :  { %v3818_v52 = vor.u32 %v4195_v63, %v3815_v2  ;;  %v3884_v2 = vld [vmem:[#allocation8 + $0x818] sm:$0xf0] }
 0x224   :  { %v1873_v50 = vpop.f32.mrf.mxu2  ;;  %v2055_v11 = vmax.f32 %v2025_v3, 0.0  ;;  %v1954_v3 = vperm.slane %v4595_v37, 2  ;;  %v4222_v37 = vld [vmem:[#allocation8 + $0x864] sm:$0xf] }
 0x225   :  { %v1874_v58 = vadd.f32 %v1873_v50, %v4593_v43  ;;  %v3767_v43 = vld [vmem:[#allocation8 + $0x738] sm:$0xf0]  ;;  %v4209_v50 = vld [vmem:[#allocation5 + $0x80] sm:$0xf0] }
 0x226   :  { %v3770_v10 = vor.u32 %v4183_v9, %v3767_v43  ;;  %v2059_v17 = vpack.c.bf16 %v2055_v11, %v2055_v11 }
 0x227   :  { %v1901_v5 = vpop.f32.mrf.mxu0 }
 0x228   :  { %2528 = vmatpush.bf16.msrb.mxu2 %v3770_v10  ;;  %2467 = vmatmul.bf16.vlgmr.msrb.gmra.mxu1 %v2059_v17  ;;  %v4193_v5 = vld [vmem:[#allocation8 + $0x784] sm:$0xf] }
 0x229   :  { %v2026_v20 = vpop.f32.mrf.mxu1  ;;  %v3810_v10 = vor.u32 %v4193_v5, %v3807_v6  ;;  %v3874_v5 = vld [vmem:[#allocation8 + $0x800] sm:$0xf]  ;;  %v4211_v6 = vld [vmem:[#allocation8 + $0x804] sm:$0xf0] }
 0x22a   :  { %v3932_v20 = vld [vmem:[#allocation8 + $0x878] sm:$0xf0] }
 0x22c   :  { %v1875_v16 = vpop.f32.mrf.mxu2  ;;  %2529 = vmatpush.bf16.msrb.mxu2 %v3762_v18  ;;  %v4225_v18 = vld [vmem:[#allocation8 + $0x874] sm:$0xf0] }
 0x22f   :  { %v2011_v0 = vpop.f32.mrf.mxu0 }
 0x230   :  { %v2012_v28 = vadd.f32 %v2011_v0, %v1952_v38  ;;  %2530 = vmatpush.bf16.msrb.mxu2 %v3754_v1  ;;  %v3931_v38 = vor.u32 %v4225_v18, %v3930_v26  ;;  %v3935_v0 = vor.u32 %v4224_v19, %v3932_v20  ;;  %v4221_v1 = vld [vmem:[#allocation8 + $0x854] sm:$0xf0] }
 0x231   :  { %v1886_v32 = vpop.f32.mrf.mxu3 }
 0x232   :  { %v2054_v51 = vmax.f32 %v2012_v28, 0.0  ;;  %v1887_v35 = vadd.f32 %v1886_v32, %v1874_v58  ;;  %v3831_v58 = vld [vmem:[#allocation8 + $0x7b8] sm:$0xf0]  ;;  %2682 = vmatpush.bf16.msrb.mxu1 %v3931_v38  ;;  %v3927_v28 = vor.u32 %v4222_v37, %v3924_v47 }
 0x233   :  { %v3834_v59 = vor.u32 %v4199_v8, %v3831_v58  ;;  %v4214_v8 = vld [vmem:[#allocation8 + $0x824] sm:$0xf] }
 0x234   :  { %v1925_v36 = vpop.f32.mrf.mxu2  ;;  %v2058_v42 = vpack.c.bf16 %v2054_v51, %v2054_v51  ;;  %v4605_v45 = vadd.f32 %v1887_v35, %v4571_v22  ;;  %2531 = vmatpush.bf16.msrb.mxu2 %v3746_v53  ;;  %v3826_v22 = vor.u32 %v4197_v61, %v3823_v62  ;;  %v3919_v51 = vor.u32 %v4220_v30, %v3916_v33  ;;  %v3906_v35 = vld [vmem:[#allocation8 + $0x840] sm:$0xf]  ;;  %v3882_v62 = vld [vmem:[#allocation8 + $0x810] sm:$0xf] }
 0x235   :  { %v1926_v27 = vadd.f32 %v1925_v36, %v4597_v40  ;;  %v3870_v40 = vor.u32 %v4209_v50, %v3869_v46  ;;  %2541 = vmatpush.bf16.msra.mxu3 %v3834_v59  ;;  %v4219_v36 = vld [vmem:[#allocation8 + $0x844] sm:$0xf0]  ;;  %v4217_v46 = vld [vmem:[#allocation8 + $0x834] sm:$0xf0]  ;;  %v4216_v50 = vld [vmem:[#allocation8 + $0x834] sm:$0xf] }
 0x236   :  { %2454 = vmatmul.bf16.vlgmr.msra.gmra.mxu0 %v2058_v42  ;;  %2683 = vmatpush.bf16.msrb.mxu1 %v3923_v25  ;;  %v3903_v56 = vor.u32 %v4216_v50, %v3900_v55  ;;  %v3892_v59 = vld [vmem:[#allocation8 + $0x828] sm:$0xf0]  ;;  %v2710_v33 = vld [vmem:[#allocation10] sm:$0x3] }
 0x237   :  { %v2013_v34 = vpop.f32.mrf.mxu0  ;;  %2577 = vmatpush.bf16.msra.mxu0 %v2569_v29  ;;  %v3907_v29 = vor.u32 %v4219_v36, %v3906_v35  ;;  %v2712_v36 = vperm.slane %v2710_v33, 0 }
 0x238   :  { %2519 = vmatmul.bf16.vlgmr.msra.gmra.mxu1 %v2059_v17  ;;  %v3890_v34 = vld [vmem:[#allocation8 + $0x820] sm:$0xf] }
 0x239   :  { %v1888_v60 = vpop.f32.mrf.mxu3  ;;  %2542 = vmatpush.bf16.msra.mxu3 %v3826_v22  ;;  %v4212_v22 = vld [vmem:[#allocation8 + $0x814] sm:$0xf] }
 0x23a   :  { %v3895_v60 = vor.u32 %v4214_v8, %v3892_v59  ;;  %v2732_v8 = vstv %s4628_s6 }
 0x23b   :  { %2578 = vmatpush.bf16.msra.mxu0 %v3870_v40  ;;  %v4215_v40 = vld [vmem:[#allocation8 + $0x824] sm:$0xf0] }
 0x23c   :  { %v1927_v31 = vpop.f32.mrf.mxu2  ;;  %v3891_v58 = vor.u32 %v4215_v40, %v3890_v34 }
 0x23d   :  { %2543 = vmatpush.bf16.msra.mxu3 %v3818_v52  ;;  %v4213_v31 = vld [vmem:[#allocation8 + $0x814] sm:$0xf0]  ;;  %v3887_v52 = vor.u32 %v4212_v22, %v3884_v2 }
 0x23e   :  { %v3883_v63 = vor.u32 %v4213_v31, %v3882_v62 }
 0x241   :  { %v1938_v4 = vpop.f32.mrf.mxu3  ;;  %2544 = vmatpush.bf16.msra.mxu3 %v3810_v10 }
 0x242   :  { %v1939_v7 = vadd.f32 %v1938_v4, %v1926_v27  ;;  %v4218_v27 = vld [vmem:[#allocation8 + $0x844] sm:$0xf] }
 0x243   :  { %v3911_v41 = vor.u32 %v4218_v27, %v3908_v39 }
 0x244   :  { %v2037_v9 = vpop.f32.mrf.mxu2  ;;  %v4609_v11 = vadd.f32 %v1939_v7, %v4580_v48  ;;  %v4210_v7 = vld [vmem:[#allocation8 + $0x804] sm:$0xf] }
 0x245   :  { %v2038_v43 = vadd.f32 %v2037_v9, %v1954_v3  ;;  %v3875_v9 = vor.u32 %v4211_v6, %v3874_v5 }
 0x246   :  { %2506 = vmatmul.bf16.vlgmr.msrb.gmra.mxu0 %v2058_v42  ;;  %v3898_v42 = vld [vmem:[#allocation8 + $0x830] sm:$0xf] }
 0x247   :  { %v2056_v54 = vmax.f32 %v2038_v43, 0.0  ;;  %v3899_v53 = vor.u32 %v4217_v46, %v3898_v42  ;;  %v3876_v43 = vld [vmem:[#allocation8 + $0x808] sm:$0xf0] }
 0x248   :  { %v3879_v10 = vor.u32 %v4210_v7, %v3876_v43 }
 0x249   :  { %v2060_v12 = vpack.c.bf16 %v2056_v54, %v2056_v54  ;;  %v1940_v49 = vpop.f32.mrf.mxu3 }
 0x24b   :  { %2480 = vmatmul.bf16.vlgmr.msra.gmra.mxu2 %v2060_v12 }
 0x24c   :  { %v2039_v14 = vpop.f32.mrf.mxu2  ;;  %2695 = vmatpush.bf16.msra.mxu2 %v3935_v0 }
 0x250   :  { %2696 = vmatpush.bf16.msra.mxu2 %v3927_v28 }
 0x251   :  { %v2050_v15 = vpop.f32.mrf.mxu3 }
 0x252   :  { %v2051_v16 = vadd.f32 %v2050_v15, %v1955_v13 }
 0x254   :  { %v2057_v17 = vmax.f32 %v2051_v16, 0.0  ;;  %2697 = vmatpush.bf16.msra.mxu2 %v3919_v51 }
 0x256   :  { %v2061_v57 = vpack.c.bf16 %v2057_v17, %v2057_v17  ;;  %3871 = vmatmul.msk.bf16.vlgmr.msra.gmra.mxu0 %vm162_vm2, %v4472_v44  ;;  %v3914_v44 = vld [vmem:[#allocation8 + $0x850] sm:$0xf] }
 0x257   :  { %v3915_v32 = vor.u32 %v4221_v1, %v3914_v44 }
 0x258   :  { %2493 = vmatmul.bf16.vlgmr.msrb.gmra.mxu3 %v2061_v57  ;;  %2698 = vmatpush.bf16.msra.mxu2 %v3911_v41  ;;  %v2720_v41 = vld [vmem:[#allocation11] sm:$0x3] }
 0x259   :  { %v2052_v48 = vpop.f32.mrf.mxu3  ;;  %2684 = vmatpush.bf16.msrb.mxu1 %v3915_v32 }
 0x25b   :  { %2532 = vmatmul.bf16.vlgmr.msrb.gmra.mxu2 %v2060_v12 }
 0x25c   :  { %2699 = vmatpush.bf16.msra.mxu2 %v3903_v56 }
 0x25d   :  { %2685 = vmatpush.bf16.msrb.mxu1 %v3907_v29  ;;  %v2713_v29 = vperm.slane %v2710_v33, 1 }
 0x260   :  { %2700 = vmatpush.bf16.msra.mxu2 %v3895_v60 }
 0x261   :  { %2686 = vmatpush.bf16.msrb.mxu1 %v3899_v53  ;;  %v2723_v53 = vperm.slane %v2720_v41, 1 }
 0x264   :  { %2701 = vmatpush.bf16.msra.mxu2 %v3887_v52 }
 0x265   :  { %2687 = vmatpush.bf16.msrb.mxu1 %v3891_v58 }
 0x268   :  { %2545 = vmatmul.bf16.vlgmr.msra.gmra.mxu3 %v2061_v57  ;;  %2702 = vmatpush.bf16.msra.mxu2 %v3879_v10  ;;  %v4237_v57 = vld [vmem:[#allocation7 + $0x10] ss:$0 sm:$0xff] }
 0x269   :  { %2688 = vmatpush.bf16.msrb.mxu1 %v3883_v63 }
 0x26d   :  { %2689 = vmatpush.bf16.msrb.mxu1 %v3875_v9 }
 0x2a5   :  { %v2468_v23 = vpop.f32.mrf.mxu1 }
 0x2ad   :  { %v2470_v61 = vpop.f32.mrf.mxu1 }
 0x2b3   :  { %v2455_v3 = vpop.f32.mrf.mxu0 }
 0x2b4   :  { %v2469_v4 = vadd.f32 %v2468_v23, %v2455_v3 }
 0x2b5   :  { %v2520_v54 = vpop.f32.mrf.mxu1 }
 0x2bb   :  { %v2457_v12 = vpop.f32.mrf.mxu0 }
 0x2bd   :  { %v2522_v49 = vpop.f32.mrf.mxu1 }
 0x2c3   :  { %v2507_v14 = vpop.f32.mrf.mxu0 }
 0x2c4   :  { %v2521_v13 = vadd.f32 %v2520_v54, %v2507_v14 }
 0x2cb   :  { %v2509_v15 = vpop.f32.mrf.mxu0 }
 0x2ce   :  { %v2481_v16 = vpop.f32.mrf.mxu2 }
 0x2cf   :  { %v2482_v17 = vadd.f32 %v2481_v16, %v2469_v4 }
 0x2d3   :  { %v2580_v48 = vpop.f32.mrf.mxu0 }
 0x2d4   :  { %v2581_v18 = vadd.f32 %v4237_v57, %v2580_v48 }
 0x2d6   :  { %v2483_v26 = vpop.f32.mrf.mxu2  ;;  %v2584_v19 = vmax.f32 %v2581_v18, 0.0 }
 0x2d8   :  { %v2585_v38 = vpack.c.bf16 %v2584_v19, %v2584_v19 }
 0x2da   :  { %2690 = vmatmul.bf16.vlgmr.msrb.gmra.mxu1 %v2585_v38  ;;  %2703 = vmatmul.bf16.vlgmr.msra.gmra.mxu2 %v2585_v38 }
 0x2db   :  { %v2494_v20 = vpop.f32.mrf.mxu3  ;;  %v2582_v0 = vpop.f32.mrf.mxu0 }
 0x2dc   :  { %v2495_v21 = vadd.f32 %v2494_v20, %v2482_v17 }
 0x2de   :  { %v2533_v24 = vpop.f32.mrf.mxu2  ;;  %v2550_v25 = vadd.f32 %v2495_v21, %v4605_v45  ;;  %v2722_v45 = vperm.slane %v2720_v41, 0 }
 0x2df   :  { %v2534_v37 = vadd.f32 %v2533_v24, %v2521_v13 }
 0x2e3   :  { %v2496_v47 = vpop.f32.mrf.mxu3 }
 0x2e6   :  { %v2535_v28 = vpop.f32.mrf.mxu2 }
 0x2eb   :  { %v2546_v44 = vpop.f32.mrf.mxu3 }
 0x2ec   :  { %v2547_v1 = vadd.f32 %v2546_v44, %v2534_v37 }
 0x2ee   :  { %v2551_v30 = vadd.f32 %v2547_v1, %v4609_v11 }
 0x2f3   :  { %v2548_v32 = vpop.f32.mrf.mxu3 }
 0x357   :  { %v2691_v51 = vpop.f32.mrf.mxu1 }
 0x358   :  { %v2708_v35 = vadd.f32 %v2691_v51, %v2550_v25 }
 0x35a   :  { %v2716_v27 = vadd.f32 %v2712_v36, %v2708_v35 }
 0x35c   :  { %v2718_v46 = vmax.f32 %v2716_v27, 0.0 }
 0x35d   :  { %v2704_v39 = vpop.f32.mrf.mxu2 }
 0x35e   :  { %v2709_v23 = vadd.f32 %v2704_v39, %v2551_v30  ;;  %v2726_v56 = vmul.f32 %v2722_v45, %v2718_v46 }
 0x35f   :  { %v2693_v42 = vpop.f32.mrf.mxu1 }
 0x360   :  { %v2717_v50 = vadd.f32 %v2713_v29, %v2709_v23 }
 0x362   :  { %v2719_v55 = vmax.f32 %v2717_v50, 0.0 }
 0x364   :  { %v2727_v34 = vmul.f32 %v2723_v53, %v2719_v55 }
 0x365   :  { %v2706_v40 = vpop.f32.mrf.mxu2 }
 0x366   :  { %v2728_v11 = vadd.f32 %v2727_v34, %v2726_v56 }
 0x368   :  { %2729 = vadd.xlane.f32.xlu0 %v2728_v11 }
 0x3db   :  { %v2730_v58 = vpop.xlane.xlu0 %2729 }
 0x3dc   :  { %v2733_v59 = vadd.f32 %v2732_v8, %v2730_v58 }
 0x3de   :  { %v3936_v60 = vmul.f32 -1.442695, %v2733_v59 }
 0x3e0   :  { %4238 = vpow2.f32 %v3936_v60 }
 0x3e6   :  { %v4239_v61 = vpop.eup %4238 }
 0x3e7   :  { %v2737_v62 = vadd.f32 1.0, %v4239_v61 }
 0x3e9   :  { %4240 = vrcp.f32 %v2737_v62  ;;  %v2749_v2 = vand.u32 2147483648, %v2737_v62  ;;  %v2747_v52 = vand.u32 2147483647, %v2737_v62  ;;  %vm2743_vm4 = vweird.f32 %v2737_v62 }
 0x3eb   :  { %v2750_v5 = vor.u32 1.1754944e-38, %v2749_v2  ;;  %vm2748_vm7 = vcmp.eq.f32.partialorder %v2747_v52, 8.507059e+37 }
 0x3ef   :  { %v4241_v31 = vpop.eup %4240 }
 0x3f0   :  { %v2739_v22 = vmul.f32 %v4241_v31, %v2737_v62  ;;  %vm2744_vm3 = vweird.f32 %v4241_v31 }
 0x3f1   :  { %vm2745_vm5 = vmor %vm2743_vm4, %vm2744_vm3 }
 0x3f2   :  { %v2740_v63 = vsub.f32 1.0, %v2739_v22 }
 0x3f4   :  { %v2741_v3 = vmul.f32 %v4241_v31, %v2740_v63 }
 0x3f6   :  { %v2742_v4 = vadd.f32 %v4241_v31, %v2741_v3 }
 0x3f8   :  { %v2746_v6 = vsel %vm2745_vm5, %v4241_v31, %v2742_v4 }
 0x3f9   :  { %v2751_v7 = vsel %vm2748_vm7, %v2750_v5, %v2746_v6 }
 0x3fa   :  { %2754 = vst.msk [vmem:[%s4629_s7] sm:$0xff] %vm2753_vm6, %v2751_v7 }
 0x3fb   :  { %2759 = vsyncpa [#allocation4], 1 }
 0x3fc   :  { %2760 = vsyncpa [#allocation6], 1 }
 0x3fd   :  { %2761 = vsyncpa [#allocation9], 1 }
 0x3fe   :  { %2762 = vsyncpa [#allocation12], 1 }

</bundles_post_ra>
